<compile_context>
chip_gen: v5e
topology: v5e:2x2
jax: 0.10.0
libtpu: 0.0.40
codegen_flags: <defaults>
</compile_context>

<pallas_src>
from typing import Any, NamedTuple, Tuple

import numpy as np
import jax
import jax.numpy as jnp
from jax.experimental import pallas as pl
from jax.experimental.pallas import tpu as pltpu


# ---------------------------------------------------------------------------
# Group element construction (same matrices / same nested loops as __init__)
# ---------------------------------------------------------------------------
_R = np.array(
    [[0,0,1,0,0,0,0,0,0,0,0,0],[1,0,0,0,0,0,0,0,0,0,0,0],[0,0,0,0,1,0,0,0,0,0,0,0],
     [0,1,0,0,0,0,0,0,0,0,0,0],[0,0,0,0,0,1,0,0,0,0,0,0],[0,0,0,1,0,0,0,0,0,0,0,0],
     [0,0,0,0,0,0,0,0,1,0,0,0],[0,0,0,0,0,0,1,0,0,0,0,0],[0,0,0,0,0,0,0,0,0,0,1,0],
     [0,0,0,0,0,0,0,1,0,0,0,0],[0,0,0,0,0,0,0,0,0,0,0,1],[0,0,0,0,0,0,0,0,0,1,0,0]],
    dtype=np.float64)
_M = np.array(
    [[0,1,0,0,0,0,0,0,0,0,0,0],[1,0,0,0,0,0,0,0,0,0,0,0],[0,0,0,1,0,0,0,0,0,0,0,0],
     [0,0,1,0,0,0,0,0,0,0,0,0],[0,0,0,0,0,1,0,0,0,0,0,0],[0,0,0,0,1,0,0,0,0,0,0,0],
     [0,0,0,0,0,0,0,1,0,0,0,0],[0,0,0,0,0,0,1,0,0,0,0,0],[0,0,0,0,0,0,0,0,0,1,0,0],
     [0,0,0,0,0,0,0,0,1,0,0,0],[0,0,0,0,0,0,0,0,0,0,0,1],[0,0,0,0,0,0,0,0,0,0,1,0]],
    dtype=np.float64)
_I = np.array(
    [[0,0,0,0,0,0,1,0,0,0,0,0],[0,0,0,0,0,0,0,1,0,0,0,0],[0,0,0,0,0,0,0,0,1,0,0,0],
     [0,0,0,0,0,0,0,0,0,1,0,0],[0,0,0,0,0,0,0,0,0,0,1,0],[0,0,0,0,0,0,0,0,0,0,0,1],
     [1,0,0,0,0,0,0,0,0,0,0,0],[0,1,0,0,0,0,0,0,0,0,0,0],[0,0,1,0,0,0,0,0,0,0,0,0],
     [0,0,0,1,0,0,0,0,0,0,0,0],[0,0,0,0,1,0,0,0,0,0,0,0],[0,0,0,0,0,1,0,0,0,0,0,0]],
    dtype=np.float64)
_O = np.array(
    [[0,0,0,0,1,0,0,0,0,0,0,0],[0,0,0,0,0,1,0,0,0,0,0,0],[0,0,1,0,0,0,0,0,0,0,0,0],
     [0,0,0,1,0,0,0,0,0,0,0,0],[1,0,0,0,0,0,0,0,0,0,0,0],[0,1,0,0,0,0,0,0,0,0,0,0],
     [0,0,0,0,0,0,0,0,0,0,1,0],[0,0,0,0,0,0,0,0,0,0,0,1],[0,0,0,0,0,0,0,0,1,0,0,0],
     [0,0,0,0,0,0,0,0,0,1,0,0],[0,0,0,0,0,0,1,0,0,0,0,0],[0,0,0,0,0,0,0,1,0,0,0,0]],
    dtype=np.float64)


def build_group_elements():
    Ts = []
    for r in range(6):
        R = _R.copy()
        for _ in range(r):
            R = R @ _R
        for m in range(2):
            M = _M.copy()
            for _ in range(m):
                M = M @ _M
            for i in range(2):
                I = _I.copy()
                for _ in range(i):
                    I = I @ _I
                for o in range(2):
                    O = _O.copy()
                    for _ in range(o):
                        O = O @ _O
                    Ts.append(R @ (M @ (I @ O)))
    return np.stack(Ts, axis=0)  # (48, 12, 12)


# ---------------------------------------------------------------------------
# Kernel: one sample tile per grid step.
#   layer 1: single lane-dense matmul (48 group elements folded into W1)
#   mid layers + output epilogue: fused per 128/256-lane slab, reusing one
#   shared kron(I_B, W) block tile as RHS for every slab.
# ---------------------------------------------------------------------------
def make_kernel(n_mid, num_slabs, slab0_width, compute_dtype):
    def kernel(x_ref, w1_ref, b1_ref, *rest):
        mid_refs = rest[:2 * n_mid]
        wo_ref = rest[2 * n_mid]
        out_ref = rest[2 * n_mid + 1]
        cd = compute_dtype

        # ---- Layer 1: (TM, 12) @ (12, G*H1), f32 accumulation --------------
        h1 = jnp.dot(x_ref[...], w1_ref[...], preferred_element_type=jnp.float32)
        h1 = jnp.maximum(h1 + b1_ref[...], 0.0)       # bias/ReLU stay f32 (VPU)

        # ---- Mid layers + fused output epilogue, per lane slab -------------
        acc = None
        for s in range(num_slabs):
            h = h1[:, s * slab0_width:(s + 1) * slab0_width]  # 128/256-aligned
            for l in range(n_mid):
                W = mid_refs[2 * l][...]        # shared kron(I_B, W_l) tile
                b = mid_refs[2 * l + 1][...]    # bias tiled over the B groups
                h = jnp.maximum(
                    jnp.dot(h.astype(cd), W,
                            preferred_element_type=jnp.float32) + b,
                    0.0)
            # Output Linear(H_last->1) + AvgPool1d(G): wo_ref holds the output
            # row tiled over the B groups of a slab, pre-scaled by 1/G.
            part = jnp.sum(h * wo_ref[...], axis=-1, keepdims=True)
            acc = part if acc is None else acc + part
        # TODO(synk): if masked (TM,1) stores ever show in the bundle, emit a
        # lane-major (1,TM) row per grid step instead and flatten on the host.
        out_ref[...] = acc

    return kernel


# ---------------------------------------------------------------------------
# Host-side parameter packing (call ONCE; hoisted out of the per-call path)
# ---------------------------------------------------------------------------
class PackedParams(NamedTuple):
    W1_all: Any            # (12, G*H1), compute dtype
    b1_all: Any            # (1, G*H1), f32
    mid: Tuple             # ((Wblk, bslab), ...) per mid layer
    wo_slab: Any           # (1, B*H_last), f32, pre-scaled by 1/G
    out_bias: float
    num_slabs: int
    slab0_width: int       # B * H1
    compute_dtype: Any


def _slab_target_lanes():
    """256-lane slabs for the 2x256x256 MXU (v6e/v7x); 128 on v5e."""
    try:
        kind = jax.devices()[0].device_kind.lower()
    except Exception:
        kind = ""
    return 128 if "v5" in kind else 256


def _choose_slab_groups(G, hidden_sizes, target_lanes):
    """Largest B | G with B*H_l % 128 == 0 for all layers and slab<=target."""
    def ok(B):
        return G % B == 0 and all((B * h) % 128 == 0 for h in hidden_sizes)
    cands = [B for B in range(1, G + 1) if ok(B)]
    if not cands:
        return G          # fallback: one slab == dense block-diagonal layer
    within = [B for B in cands if B * max(hidden_sizes) <= target_lanes]
    return max(within) if within else min(cands)


def pack_parameters(Ts, hidden_W, hidden_b, out_W, out_b,
                    compute_dtype=jnp.float32, slab_lanes=None):
    f32 = jnp.float32
    hp = jax.lax.Precision.HIGHEST
    Ts = jnp.asarray(Ts, f32)
    G, D, _ = Ts.shape
    hidden_sizes = [int(W.shape[1]) for W in hidden_W]
    H1, H_last = hidden_sizes[0], int(out_W.shape[0])
    assert int(out_W.shape[1]) == 1, \
        "AvgPool1d(group) == per-sample group mean only for output_size=1"

    if slab_lanes is None:
        slab_lanes = _slab_target_lanes()
    B = _choose_slab_groups(G, hidden_sizes, slab_lanes)   # groups per slab
    num_slabs = G // B

    # W1_all[:, g*H1:(g+1)*H1] = T_g @ W1  (exact: T_g are permutation matrices)
    # so x @ W1_all == concat_g((x @ T_g) @ W1), matching the PyTorch forward.
    W1_all = jnp.einsum('gde,eh->dgh', Ts, jnp.asarray(hidden_W[0], f32),
                        precision=hp).reshape(D, G * H1)
    b1_all = jnp.tile(jnp.asarray(hidden_b[0], f32).reshape(1, H1), (1, G))

    eyeB = jnp.eye(B, dtype=f32)
    mid = []
    for W, b in zip(hidden_W[1:], hidden_b[1:]):
        Wblk = jnp.kron(eyeB, jnp.asarray(W, f32)).astype(compute_dtype)
        bslab = jnp.tile(jnp.asarray(b, f32).reshape(1, -1), (1, B))
        mid.append((Wblk, bslab))

    # Output row tiled over the B groups of one slab, pre-scaled by 1/G.
    wo_slab = jnp.tile(jnp.asarray(out_W, f32).reshape(1, H_last), (1, B)) / float(G)
    bo = float(np.asarray(out_b, np.float32).reshape(-1)[0])

    return PackedParams(W1_all.astype(compute_dtype), b1_all, tuple(mid),
                        wo_slab, bo, num_slabs, B * H1, compute_dtype)


def _choose_tm(N, compute_dtype):
    """Sample-tile rows per grid step."""
    # bf16 sublane packing is (16,128) -> keep row tiles 16-aligned for bf16.
    align = 16 if jnp.dtype(compute_dtype) == jnp.dtype(jnp.bfloat16) else 8
    if N <= 2 * align:
        return align
    # >= 2 grid steps whenever there is enough work so both v7x TensorCores
    # get a "parallel" slice; cap at 512 rows/step.
    tm = min(512, (N // (2 * align)) * align)
    return max(tm, align)


# ---------------------------------------------------------------------------
# Forward builder: returns a jitted  x (N,12) -> pooled value (N,)  closure.
# (Pooled value BEFORE the permutation sign of x[0] is applied.)
# ---------------------------------------------------------------------------
def make_forward(packed: PackedParams):
    cd = packed.compute_dtype
    D = packed.W1_all.shape[0]
    n_mid = len(packed.mid)

    def fwd(x):
        N = x.shape[0]
        TM = _choose_tm(N, cd)
        N_pad = -(-N // TM) * TM
        x_pad = jnp.pad(x.astype(cd), ((0, N_pad - N), (0, 0)))

        args = [x_pad, packed.W1_all, packed.b1_all]
        in_specs = [
            pl.BlockSpec((TM, D), lambda i: (i, 0)),            # x: streamed
            pl.BlockSpec(packed.W1_all.shape, lambda i: (0, 0)),  # resident
            pl.BlockSpec(packed.b1_all.shape, lambda i: (0, 0)),
        ]
        for Wblk, bslab in packed.mid:
            in_specs.append(pl.BlockSpec(Wblk.shape, lambda i: (0, 0)))
            in_specs.append(pl.BlockSpec(bslab.shape, lambda i: (0, 0)))
            args += [Wblk, bslab]
        in_specs.append(pl.BlockSpec(packed.wo_slab.shape, lambda i: (0, 0)))
        args.append(packed.wo_slab)

        pooled = pl.pallas_call(
            make_kernel(n_mid, packed.num_slabs, packed.slab0_width, cd),
            out_shape=jax.ShapeDtypeStruct((N_pad, 1), jnp.float32),
            grid=(N_pad // TM,),
            in_specs=in_specs,
            out_specs=pl.BlockSpec((TM, 1), lambda i: (i, 0)),
            compiler_params=pltpu.CompilerParams(
                dimension_semantics=("parallel",),
                vmem_limit_bytes=24 * 1024 * 1024),
        )(*args)

        # Output bias applied once, after the group mean (AvgPool fold).
        return pooled[:N, 0] + packed.out_bias

    return jax.jit(fwd)


# ---------------------------------------------------------------------------
# Host-side glue: permutation sign of x[0] (same as the numpy code in forward)
# ---------------------------------------------------------------------------
def permutation_sign(state):
    state = np.asarray(state, dtype=np.float64)
    hex_order = [0, 1, 3, 5, 4, 2, 6, 7, 9, 11, 10, 8]
    order = state * np.arange(1, 13)
    state_in_hex = order[hex_order]
    state_in_hex = state_in_hex[np.where(state_in_hex > 0.1)]
    order = np.argsort(state_in_hex)
    # Permutation(order).signature() == (-1)^(# inversions)
    inv_count = 0
    for i in range(len(order)):
        for j in range(i + 1, len(order)):
            if order[i] > order[j]:
                inv_count += 1
    return 1.0 if inv_count % 2 == 0 else -1.0


# ---------------------------------------------------------------------------
# Pure-JAX reference (original per-group structure).  The matmul operand
# dtypes mirror the kernel (f32 accumulation), so kernel-vs-reference
# differences are summation-order only -> tight, stable tolerances.
# ---------------------------------------------------------------------------
def reference_value(x, Ts, hidden_W, hidden_b, out_W, out_b,
                    compute_dtype=jnp.float32):
    f32 = jnp.float32
    cd = compute_dtype
    hp = jax.lax.Precision.HIGHEST
    G = Ts.shape[0]

    def mm(a, b):
        if jnp.dtype(cd) == jnp.dtype(f32):
            return jnp.dot(a, b, precision=hp, preferred_element_type=f32)
        return jnp.dot(a.astype(cd), b.astype(cd), preferred_element_type=f32)

    inv = jnp.einsum('nd,gde->nge', x.astype(f32), jnp.asarray(Ts, f32),
                     precision=hp)                         # (N,G,12) exact perms
    h = inv.reshape(-1, x.shape[1])                        # sample-major, g fastest
    for W, b in zip(hidden_W, hidden_b):
        h = jnp.maximum(mm(h, jnp.asarray(W, f32)) +
                        jnp.asarray(b, f32).reshape(1, -1), 0.0)
    # Output layer + pooling kept in f32 (matches the kernel's f32 epilogue).
    h = jnp.dot(h, jnp.asarray(out_W, f32), precision=hp,
                preferred_element_type=f32) + jnp.asarray(out_b, f32).reshape(1, -1)
    return h.reshape(x.shape[0], G).mean(axis=1)           # AvgPool1d(G)


if __name__ == "__main__":
    key = jax.random.PRNGKey(0)
    k_x1, k_x2, k_w, k_b = jax.random.split(key, 4)

    # Module-consistent shapes
    input_size = 12          # fixed by the 12x12 group matrices
    architecture = [32, 32]  # hidden layer sizes
    output_size = 1          # <x|psi> scalar per symmetrized sample

    Ts = jnp.asarray(build_group_elements(), dtype=jnp.float32)   # (48,12,12)

    # Linear parameters stored as (in, out) so the kernel does h @ W + b
    # (== PyTorch x @ weight.T + bias).
    sizes = [input_size] + architecture
    wkeys = jax.random.split(k_w, len(architecture) + 1)
    bkeys = jax.random.split(k_b, len(architecture) + 1)
    hidden_W, hidden_b = [], []
    for li, (h_in, h_out) in enumerate(zip(sizes[:-1], sizes[1:])):
        scale = 1.0 / np.sqrt(h_in)
        hidden_W.append(scale * jax.random.normal(wkeys[li], (h_in, h_out), jnp.float32))
        hidden_b.append(0.1 * jax.random.normal(bkeys[li], (1, h_out), jnp.float32))
    scale = 1.0 / np.sqrt(sizes[-1])
    out_W = scale * jax.random.normal(wkeys[-1], (sizes[-1], output_size), jnp.float32)
    out_b = 0.1 * jax.random.normal(bkeys[-1], (1, output_size), jnp.float32)

    # ---- Test 1: tiny batch (N=2), f32 matmul operands --------------------
    packed_f32 = pack_parameters(Ts, hidden_W, hidden_b, out_W, out_b,
                                 compute_dtype=jnp.float32)
    fwd_f32 = make_forward(packed_f32)

    N1 = 2
    x1 = jax.random.normal(k_x1, (N1, input_size), jnp.float32)
    val1 = jax.block_until_ready(fwd_f32(x1))
    sign1 = permutation_sign(np.asarray(x1)[0])
    res1 = sign1 * val1
    ref1 = sign1 * reference_value(x1, Ts, hidden_W, hidden_b, out_W, out_b,
                                   compute_dtype=jnp.float32)
    np.testing.assert_allclose(np.asarray(res1), np.asarray(ref1),
                               rtol=1e-3, atol=1e-3)

    # ---- Test 2: larger batch, multi-step parallel grid, bf16 operands ----
    packed_bf16 = pack_parameters(Ts, hidden_W, hidden_b, out_W, out_b,
                                  compute_dtype=jnp.bfloat16)
    fwd_bf16 = make_forward(packed_bf16)

    N2 = 512
    x2 = jax.random.normal(k_x2, (N2, input_size), jnp.float32)
    val2 = jax.block_until_ready(fwd_bf16(x2))
    sign2 = permutation_sign(np.asarray(x2)[0])
    res2 = sign2 * val2
    ref2 = sign2 * reference_value(x2, Ts, hidden_W, hidden_b, out_W, out_b,
                                   compute_dtype=jnp.bfloat16)
    np.testing.assert_allclose(np.asarray(res2), np.asarray(ref2),
                               rtol=2e-3, atol=2e-3)

    print("KERNEL_OK")
</pallas_src>

<mosaic_0001>
module attributes {stable_mosaic.version = 11 : i64} {
  func.func @kernel(%arg0: i32, %arg1: memref<8x12xf32, #tpu.memory_space<vmem>>, %arg2: memref<12x1536xf32, #tpu.memory_space<vmem>>, %arg3: memref<1x1536xf32, #tpu.memory_space<vmem>>, %arg4: memref<256x256xf32, #tpu.memory_space<vmem>>, %arg5: memref<1x256xf32, #tpu.memory_space<vmem>>, %arg6: memref<1x256xf32, #tpu.memory_space<vmem>>, %arg7: memref<8x1xf32, #tpu.memory_space<vmem>>) attributes {dimension_semantics = [#tpu.dimension_semantics<parallel>], iteration_bounds = array<i64: 1>, scalar_prefetch = 0 : i64, scratch_operands = 0 : i64, tpu.core_type = #tpu.core_type<tc>, window_params = [{transform_indices = @transform_0, window_bounds = array<i64: 8, 12>}, {pipeline_mode = #tpu.pipeline_mode<synchronous>, transform_indices = @transform_1, window_bounds = array<i64: 12, 1536>}, {pipeline_mode = #tpu.pipeline_mode<synchronous>, transform_indices = @transform_2, window_bounds = array<i64: 1, 1536>}, {pipeline_mode = #tpu.pipeline_mode<synchronous>, transform_indices = @transform_3, window_bounds = array<i64: 256, 256>}, {pipeline_mode = #tpu.pipeline_mode<synchronous>, transform_indices = @transform_4, window_bounds = array<i64: 1, 256>}, {pipeline_mode = #tpu.pipeline_mode<synchronous>, transform_indices = @transform_5, window_bounds = array<i64: 1, 256>}, {transform_indices = @transform_6, window_bounds = array<i64: 8, 1>}]} {
    %c0 = arith.constant 0 : index
    %c0_0 = arith.constant 0 : index
    %0 = vector.load %arg1[%c0, %c0_0] : memref<8x12xf32, #tpu.memory_space<vmem>>, vector<8x12xf32>
    %c0_1 = arith.constant 0 : index
    %c0_2 = arith.constant 0 : index
    %1 = vector.load %arg2[%c0_1, %c0_2] : memref<12x1536xf32, #tpu.memory_space<vmem>>, vector<12x1536xf32>
    %cst = arith.constant dense<0.000000e+00> : vector<8x1536xf32>
    %2 = tpu.matmul %0, %1, %cst {dimension_numbers = #tpu.dot_dimension_numbers<[1], [0], [0], [1], [0, 0, 1, 1], [], []>} : vector<8x12xf32>, vector<12x1536xf32>, vector<8x1536xf32> -> vector<8x1536xf32>
    %c0_3 = arith.constant 0 : index
    %c0_4 = arith.constant 0 : index
    %3 = vector.load %arg3[%c0_3, %c0_4] : memref<1x1536xf32, #tpu.memory_space<vmem>>, vector<1x1536xf32>
    %4 = vector.broadcast %3 : vector<1x1536xf32> to vector<8x1536xf32>
    %5 = arith.addf %2, %4 : vector<8x1536xf32>
    %cst_5 = arith.constant 0.000000e+00 : f32
    %6 = vector.broadcast %cst_5 : f32 to vector<8x1536xf32>
    %7 = arith.maximumf %5, %6 : vector<8x1536xf32>
    %8 = vector.extract_strided_slice %7 {offsets = [0, 0], sizes = [8, 256], strides = [1, 1]} : vector<8x1536xf32> to vector<8x256xf32>
    %c0_6 = arith.constant 0 : index
    %c0_7 = arith.constant 0 : index
    %9 = vector.load %arg4[%c0_6, %c0_7] : memref<256x256xf32, #tpu.memory_space<vmem>>, vector<256x256xf32>
    %c0_8 = arith.constant 0 : index
    %c0_9 = arith.constant 0 : index
    %10 = vector.load %arg5[%c0_8, %c0_9] : memref<1x256xf32, #tpu.memory_space<vmem>>, vector<1x256xf32>
    %cst_10 = arith.constant dense<0.000000e+00> : vector<8x256xf32>
    %11 = tpu.matmul %8, %9, %cst_10 {dimension_numbers = #tpu.dot_dimension_numbers<[1], [0], [0], [1], [0, 0, 1, 1], [], []>} : vector<8x256xf32>, vector<256x256xf32>, vector<8x256xf32> -> vector<8x256xf32>
    %12 = vector.broadcast %10 : vector<1x256xf32> to vector<8x256xf32>
    %13 = arith.addf %11, %12 : vector<8x256xf32>
    %cst_11 = arith.constant 0.000000e+00 : f32
    %14 = vector.broadcast %cst_11 : f32 to vector<8x256xf32>
    %15 = arith.maximumf %13, %14 : vector<8x256xf32>
    %c0_12 = arith.constant 0 : index
    %c0_13 = arith.constant 0 : index
    %16 = vector.load %arg6[%c0_12, %c0_13] : memref<1x256xf32, #tpu.memory_space<vmem>>, vector<1x256xf32>
    %17 = vector.broadcast %16 : vector<1x256xf32> to vector<8x256xf32>
    %18 = arith.mulf %15, %17 : vector<8x256xf32>
    %cst_14 = arith.constant dense<0.000000e+00> : vector<8xf32>
    %19 = vector.multi_reduction <add>, %18, %cst_14 [1] : vector<8x256xf32> to vector<8xf32>
    %20 = vector.shape_cast %19 : vector<8xf32> to vector<8x1xf32>
    %21 = vector.extract_strided_slice %7 {offsets = [0, 256], sizes = [8, 256], strides = [1, 1]} : vector<8x1536xf32> to vector<8x256xf32>
    %c0_15 = arith.constant 0 : index
    %c0_16 = arith.constant 0 : index
    %22 = vector.load %arg4[%c0_15, %c0_16] : memref<256x256xf32, #tpu.memory_space<vmem>>, vector<256x256xf32>
    %c0_17 = arith.constant 0 : index
    %c0_18 = arith.constant 0 : index
    %23 = vector.load %arg5[%c0_17, %c0_18] : memref<1x256xf32, #tpu.memory_space<vmem>>, vector<1x256xf32>
    %cst_19 = arith.constant dense<0.000000e+00> : vector<8x256xf32>
    %24 = tpu.matmul %21, %22, %cst_19 {dimension_numbers = #tpu.dot_dimension_numbers<[1], [0], [0], [1], [0, 0, 1, 1], [], []>} : vector<8x256xf32>, vector<256x256xf32>, vector<8x256xf32> -> vector<8x256xf32>
    %25 = vector.broadcast %23 : vector<1x256xf32> to vector<8x256xf32>
    %26 = arith.addf %24, %25 : vector<8x256xf32>
    %cst_20 = arith.constant 0.000000e+00 : f32
    %27 = vector.broadcast %cst_20 : f32 to vector<8x256xf32>
    %28 = arith.maximumf %26, %27 : vector<8x256xf32>
    %c0_21 = arith.constant 0 : index
    %c0_22 = arith.constant 0 : index
    %29 = vector.load %arg6[%c0_21, %c0_22] : memref<1x256xf32, #tpu.memory_space<vmem>>, vector<1x256xf32>
    %30 = vector.broadcast %29 : vector<1x256xf32> to vector<8x256xf32>
    %31 = arith.mulf %28, %30 : vector<8x256xf32>
    %cst_23 = arith.constant dense<0.000000e+00> : vector<8xf32>
    %32 = vector.multi_reduction <add>, %31, %cst_23 [1] : vector<8x256xf32> to vector<8xf32>
    %33 = vector.shape_cast %32 : vector<8xf32> to vector<8x1xf32>
    %34 = arith.addf %20, %33 : vector<8x1xf32>
    %35 = vector.extract_strided_slice %7 {offsets = [0, 512], sizes = [8, 256], strides = [1, 1]} : vector<8x1536xf32> to vector<8x256xf32>
    %c0_24 = arith.constant 0 : index
    %c0_25 = arith.constant 0 : index
    %36 = vector.load %arg4[%c0_24, %c0_25] : memref<256x256xf32, #tpu.memory_space<vmem>>, vector<256x256xf32>
    %c0_26 = arith.constant 0 : index
    %c0_27 = arith.constant 0 : index
    %37 = vector.load %arg5[%c0_26, %c0_27] : memref<1x256xf32, #tpu.memory_space<vmem>>, vector<1x256xf32>
    %cst_28 = arith.constant dense<0.000000e+00> : vector<8x256xf32>
    %38 = tpu.matmul %35, %36, %cst_28 {dimension_numbers = #tpu.dot_dimension_numbers<[1], [0], [0], [1], [0, 0, 1, 1], [], []>} : vector<8x256xf32>, vector<256x256xf32>, vector<8x256xf32> -> vector<8x256xf32>
    %39 = vector.broadcast %37 : vector<1x256xf32> to vector<8x256xf32>
    %40 = arith.addf %38, %39 : vector<8x256xf32>
    %cst_29 = arith.constant 0.000000e+00 : f32
    %41 = vector.broadcast %cst_29 : f32 to vector<8x256xf32>
    %42 = arith.maximumf %40, %41 : vector<8x256xf32>
    %c0_30 = arith.constant 0 : index
    %c0_31 = arith.constant 0 : index
    %43 = vector.load %arg6[%c0_30, %c0_31] : memref<1x256xf32, #tpu.memory_space<vmem>>, vector<1x256xf32>
    %44 = vector.broadcast %43 : vector<1x256xf32> to vector<8x256xf32>
    %45 = arith.mulf %42, %44 : vector<8x256xf32>
    %cst_32 = arith.constant dense<0.000000e+00> : vector<8xf32>
    %46 = vector.multi_reduction <add>, %45, %cst_32 [1] : vector<8x256xf32> to vector<8xf32>
    %47 = vector.shape_cast %46 : vector<8xf32> to vector<8x1xf32>
    %48 = arith.addf %34, %47 : vector<8x1xf32>
    %49 = vector.extract_strided_slice %7 {offsets = [0, 768], sizes = [8, 256], strides = [1, 1]} : vector<8x1536xf32> to vector<8x256xf32>
    %c0_33 = arith.constant 0 : index
    %c0_34 = arith.constant 0 : index
    %50 = vector.load %arg4[%c0_33, %c0_34] : memref<256x256xf32, #tpu.memory_space<vmem>>, vector<256x256xf32>
    %c0_35 = arith.constant 0 : index
    %c0_36 = arith.constant 0 : index
    %51 = vector.load %arg5[%c0_35, %c0_36] : memref<1x256xf32, #tpu.memory_space<vmem>>, vector<1x256xf32>
    %cst_37 = arith.constant dense<0.000000e+00> : vector<8x256xf32>
    %52 = tpu.matmul %49, %50, %cst_37 {dimension_numbers = #tpu.dot_dimension_numbers<[1], [0], [0], [1], [0, 0, 1, 1], [], []>} : vector<8x256xf32>, vector<256x256xf32>, vector<8x256xf32> -> vector<8x256xf32>
    %53 = vector.broadcast %51 : vector<1x256xf32> to vector<8x256xf32>
    %54 = arith.addf %52, %53 : vector<8x256xf32>
    %cst_38 = arith.constant 0.000000e+00 : f32
    %55 = vector.broadcast %cst_38 : f32 to vector<8x256xf32>
    %56 = arith.maximumf %54, %55 : vector<8x256xf32>
    %c0_39 = arith.constant 0 : index
    %c0_40 = arith.constant 0 : index
    %57 = vector.load %arg6[%c0_39, %c0_40] : memref<1x256xf32, #tpu.memory_space<vmem>>, vector<1x256xf32>
    %58 = vector.broadcast %57 : vector<1x256xf32> to vector<8x256xf32>
    %59 = arith.mulf %56, %58 : vector<8x256xf32>
    %cst_41 = arith.constant dense<0.000000e+00> : vector<8xf32>
    %60 = vector.multi_reduction <add>, %59, %cst_41 [1] : vector<8x256xf32> to vector<8xf32>
    %61 = vector.shape_cast %60 : vector<8xf32> to vector<8x1xf32>
    %62 = arith.addf %48, %61 : vector<8x1xf32>
    %63 = vector.extract_strided_slice %7 {offsets = [0, 1024], sizes = [8, 256], strides = [1, 1]} : vector<8x1536xf32> to vector<8x256xf32>
    %c0_42 = arith.constant 0 : index
    %c0_43 = arith.constant 0 : index
    %64 = vector.load %arg4[%c0_42, %c0_43] : memref<256x256xf32, #tpu.memory_space<vmem>>, vector<256x256xf32>
    %c0_44 = arith.constant 0 : index
    %c0_45 = arith.constant 0 : index
    %65 = vector.load %arg5[%c0_44, %c0_45] : memref<1x256xf32, #tpu.memory_space<vmem>>, vector<1x256xf32>
    %cst_46 = arith.constant dense<0.000000e+00> : vector<8x256xf32>
    %66 = tpu.matmul %63, %64, %cst_46 {dimension_numbers = #tpu.dot_dimension_numbers<[1], [0], [0], [1], [0, 0, 1, 1], [], []>} : vector<8x256xf32>, vector<256x256xf32>, vector<8x256xf32> -> vector<8x256xf32>
    %67 = vector.broadcast %65 : vector<1x256xf32> to vector<8x256xf32>
    %68 = arith.addf %66, %67 : vector<8x256xf32>
    %cst_47 = arith.constant 0.000000e+00 : f32
    %69 = vector.broadcast %cst_47 : f32 to vector<8x256xf32>
    %70 = arith.maximumf %68, %69 : vector<8x256xf32>
    %c0_48 = arith.constant 0 : index
    %c0_49 = arith.constant 0 : index
    %71 = vector.load %arg6[%c0_48, %c0_49] : memref<1x256xf32, #tpu.memory_space<vmem>>, vector<1x256xf32>
    %72 = vector.broadcast %71 : vector<1x256xf32> to vector<8x256xf32>
    %73 = arith.mulf %70, %72 : vector<8x256xf32>
    %cst_50 = arith.constant dense<0.000000e+00> : vector<8xf32>
    %74 = vector.multi_reduction <add>, %73, %cst_50 [1] : vector<8x256xf32> to vector<8xf32>
    %75 = vector.shape_cast %74 : vector<8xf32> to vector<8x1xf32>
    %76 = arith.addf %62, %75 : vector<8x1xf32>
    %77 = vector.extract_strided_slice %7 {offsets = [0, 1280], sizes = [8, 256], strides = [1, 1]} : vector<8x1536xf32> to vector<8x256xf32>
    %c0_51 = arith.constant 0 : index
    %c0_52 = arith.constant 0 : index
    %78 = vector.load %arg4[%c0_51, %c0_52] : memref<256x256xf32, #tpu.memory_space<vmem>>, vector<256x256xf32>
    %c0_53 = arith.constant 0 : index
    %c0_54 = arith.constant 0 : index
    %79 = vector.load %arg5[%c0_53, %c0_54] : memref<1x256xf32, #tpu.memory_space<vmem>>, vector<1x256xf32>
    %cst_55 = arith.constant dense<0.000000e+00> : vector<8x256xf32>
    %80 = tpu.matmul %77, %78, %cst_55 {dimension_numbers = #tpu.dot_dimension_numbers<[1], [0], [0], [1], [0, 0, 1, 1], [], []>} : vector<8x256xf32>, vector<256x256xf32>, vector<8x256xf32> -> vector<8x256xf32>
    %81 = vector.broadcast %79 : vector<1x256xf32> to vector<8x256xf32>
    %82 = arith.addf %80, %81 : vector<8x256xf32>
    %cst_56 = arith.constant 0.000000e+00 : f32
    %83 = vector.broadcast %cst_56 : f32 to vector<8x256xf32>
    %84 = arith.maximumf %82, %83 : vector<8x256xf32>
    %c0_57 = arith.constant 0 : index
    %c0_58 = arith.constant 0 : index
    %85 = vector.load %arg6[%c0_57, %c0_58] : memref<1x256xf32, #tpu.memory_space<vmem>>, vector<1x256xf32>
    %86 = vector.broadcast %85 : vector<1x256xf32> to vector<8x256xf32>
    %87 = arith.mulf %84, %86 : vector<8x256xf32>
    %cst_59 = arith.constant dense<0.000000e+00> : vector<8xf32>
    %88 = vector.multi_reduction <add>, %87, %cst_59 [1] : vector<8x256xf32> to vector<8xf32>
    %89 = vector.shape_cast %88 : vector<8xf32> to vector<8x1xf32>
    %90 = arith.addf %76, %89 : vector<8x1xf32>
    %c0_60 = arith.constant 0 : index
    %c0_61 = arith.constant 0 : index
    %91 = vector.load %arg7[%c0_60, %c0_61] : memref<8x1xf32, #tpu.memory_space<vmem>>, vector<8x1xf32>
    tpu.vector_store %arg7[%c0_60, %c0_61], %90 {strides = array<i32>} : memref<8x1xf32, #tpu.memory_space<vmem>>, vector<8x1xf32>,
    return
  }
  func.func @transform_0(%arg0: i32) -> (i32, i32) {
    %c0_i32 = arith.constant 0 : i32
    %c0_i32_0 = arith.constant 0 : i32
    return %arg0, %c0_i32 : i32, i32
  }
  func.func @transform_1(%arg0: i32) -> (i32, i32) {
    %c0_i32 = arith.constant 0 : i32
    %c0_i32_0 = arith.constant 0 : i32
    %c0_i32_1 = arith.constant 0 : i32
    return %c0_i32, %c0_i32_0 : i32, i32
  }
  func.func @transform_2(%arg0: i32) -> (i32, i32) {
    %c0_i32 = arith.constant 0 : i32
    %c0_i32_0 = arith.constant 0 : i32
    %c0_i32_1 = arith.constant 0 : i32
    return %c0_i32, %c0_i32_0 : i32, i32
  }
  func.func @transform_3(%arg0: i32) -> (i32, i32) {
    %c0_i32 = arith.constant 0 : i32
    %c0_i32_0 = arith.constant 0 : i32
    %c0_i32_1 = arith.constant 0 : i32
    return %c0_i32, %c0_i32_0 : i32, i32
  }
  func.func @transform_4(%arg0: i32) -> (i32, i32) {
    %c0_i32 = arith.constant 0 : i32
    %c0_i32_0 = arith.constant 0 : i32
    %c0_i32_1 = arith.constant 0 : i32
    return %c0_i32, %c0_i32_0 : i32, i32
  }
  func.func @transform_5(%arg0: i32) -> (i32, i32) {
    %c0_i32 = arith.constant 0 : i32
    %c0_i32_0 = arith.constant 0 : i32
    %c0_i32_1 = arith.constant 0 : i32
    return %c0_i32, %c0_i32_0 : i32, i32
  }
  func.func @transform_6(%arg0: i32) -> (i32, i32) {
    %c0_i32 = arith.constant 0 : i32
    %c0_i32_0 = arith.constant 0 : i32
    return %arg0, %c0_i32 : i32, i32
  }
}

</mosaic_0001>

<bundles_post_ra>
// kernel: fwd.1
= control target key start
LH: loop header
LB: loop body
LE: loop exit
PB: predicated region body
PF: predicated region fallthrough
CT: control target
= control target key end

     0   :  { %11 = vsyncpa [#allocation3], 0  ;;  %s1796_s0 = inlined_call_operand.vmem [shape: f32[8,12], index: 0, kind: input, shape index: {}]   ;;  %s1797_s1 = inlined_call_operand.hbm [shape: f32[12,1536], index: 1, kind: input, shape index: {}]   ;;  %s1798_s2 = inlined_call_operand.vmem [shape: f32[1,1536], index: 2, kind: input, shape index: {}]   ;;  %s1799_s3 = inlined_call_operand.hbm [shape: f32[256,256], index: 3, kind: input, shape index: {}]   ;;  %s1800_s4 = inlined_call_operand.hbm [shape: f32[1,256], index: 4, kind: input, shape index: {}]   ;;  %s1801_s5 = inlined_call_operand.vmem [shape: f32[1,256], index: 5, kind: input, shape index: {}]   ;;  %s1802_s6 = inlined_call_operand.vmem [shape: f32[8,1], index: 6, kind: output, shape index: {}]  }
   0x1   :  { %12 = vsyncpa [#allocation5], 0  ;;  %s34_s23 = sshll.u32 %s1799_s3, 4  ;;  %s1132_s24 = smov [#allocation4]   ;;  %s35_s23 = int_to_ptr.hbm [resolvable:$true] %s34_s23 }
   0x2   :  { %s36_s25 = sshll.u32 %s1132_s24, 4  ;;  %s19_s28 = sshll.u32 %s1797_s1, 4  ;;  %s37_s25 = int_to_ptr.vmem [resolvable:$true] %s36_s25  ;;  %s20_s28 = int_to_ptr.hbm [resolvable:$true] %s19_s28 }
   0x3   :  { %s1133_s29 = smov 256   ;;  %s1134_s30 = smov 16  }
   0x4   :  { %42 = dma.hbm_to_vmem [thread:$0]  %s35_s23, 8192, %s37_s25, [#allocation5], %s1133_s29, %s1133_s29, %s1134_s30  }
   0x5   :  { %s1135_s7 = smov [#allocation2]   ;;  %s1136_s9 = smov 1536  }
   0x6   :  { %s21_s8 = sshll.u32 %s1135_s7, 4  ;;  %s1137_s10 = smov 96   ;;  %s22_s8 = int_to_ptr.vmem [resolvable:$true] %s21_s8 }
   0x7   :  { %27 = dma.hbm_to_vmem [thread:$0]  %s20_s28, 3072, %s22_s8, [#allocation3], %s1136_s9, %s1136_s9, %s1137_s10  }
   0x8   :  { %s48_s12 = sshll.u32 %s1800_s4, 4  ;;  %s1138_s13 = smov [#allocation6]   ;;  %s49_s12 = int_to_ptr.hbm [resolvable:$true] %s48_s12 }
   0x9   :  { %s50_s14 = sshll.u32 %s1138_s13, 4  ;;  %s51_s14 = int_to_ptr.vmem [resolvable:$true] %s50_s14 }
   0xa   :  { %53 = dma.hbm_to_vmem [thread:$0]  %s49_s12, 32, %s51_s14, [#allocation5]  }
   0xb   :  { %1128 = dma.done.wait [#allocation3], 3072  }
   0xc   :  { %1129 = vsyncadd [#allocation3], 4294964224 }
   0xd   :  { %1130 = dma.done.wait [#allocation5], 8224  }
   0xe   :  { %1131 = vsyncadd [#allocation5], 4294959072  ;;  %vm125_vm0 = vcmask 1043456   ;;  %v81_v0 = vld [vmem:[#allocation2 + $0x60] sm:$0xf]  ;;  %v70_v3 = vld [vmem:[#allocation2 + $0x8] sm:$0xff] }
   0xf   :  { %v82_v1 = vld [vmem:[#allocation2 + $0x68] sm:$0xf]  ;;  %v69_v2 = vld [vmem:[#allocation2] sm:$0xff]  ;;  %1025 = vmatpush.msk.msra.mxu0 %vm125_vm0, %v81_v0  ;;  %v83_v4 = vld [vmem:[#allocation2 + $0x70] sm:$0xf]  ;;  %vm121_vm1 = vcmask 97280  }
  0x10   :  { %1027 = vmatpush.msk.msra.mxu1 %vm125_vm0, %v82_v1  ;;  %v1188_v5 = vld [vmem:[%s1796_s0] sm:$0xff]  ;;  %1029 = vmatpush.msk.msra.mxu2 %vm125_vm0, %v83_v4  ;;  %v71_v6 = vld [vmem:[#allocation2 + $0x10] sm:$0xff]  ;;  %v84_v7 = vld [vmem:[#allocation2 + $0x78] sm:$0xf]  ;;  %vm1017_vm2 = vcmask 7168  }
  0x11   :  { %177 = vmatpush.msra.mxu0 %v69_v2  ;;  %v85_v8 = vld [vmem:[#allocation2 + $0x80] sm:$0xf]  ;;  %v72_v9 = vld [vmem:[#allocation2 + $0x18] sm:$0xff]  ;;  %v86_v10 = vld [vmem:[#allocation2 + $0x88] sm:$0xf]  ;;  %1031 = vmatpush.msk.msra.mxu3 %vm125_vm0, %v84_v7 }
  0x12   :  { %197 = vmatpush.msra.mxu1 %v70_v3  ;;  %1026 = vmatmul.msk.f32.vlgmr.msra.gmra.mxu0 %vm121_vm1, %v1188_v5  ;;  %v73_v11 = vld [vmem:[#allocation2 + $0x20] sm:$0xff]  ;;  %v74_v12 = vld [vmem:[#allocation2 + $0x28] sm:$0xff]  ;;  %v87_v13 = vld [vmem:[#allocation2 + $0x90] sm:$0xf] }
  0x13   :  { %1028 = vmatmul.msk.f32.vlgmr.msra.gmra.mxu1 %vm121_vm1, %v1188_v5  ;;  %217 = vmatpush.msra.mxu2 %v71_v6  ;;  %v88_v14 = vld [vmem:[#allocation2 + $0x98] sm:$0xf]  ;;  %v89_v15 = vld [vmem:[#allocation2 + $0xa0] sm:$0xf]  ;;  %v75_v16 = vld [vmem:[#allocation2 + $0x30] sm:$0xff] }
  0x14   :  { %1030 = vmatmul.msk.f32.vlgmr.msra.gmra.mxu2 %vm121_vm1, %v1188_v5  ;;  %1033 = vmatpush.msk.msrb.mxu0 %vm125_vm0, %v85_v8  ;;  %v90_v17 = vld [vmem:[#allocation2 + $0xa8] sm:$0xf]  ;;  %v76_v18 = vld [vmem:[#allocation2 + $0x38] sm:$0xff]  ;;  %v91_v19 = vld [vmem:[#allocation2 + $0xb0] sm:$0xf] }
  0x15   :  { %237 = vmatpush.msra.mxu3 %v72_v9  ;;  %1035 = vmatpush.msk.msrb.mxu1 %vm125_vm0, %v86_v10  ;;  %v92_v20 = vld [vmem:[#allocation2 + $0xb8] sm:$0xf]  ;;  %v77_v21 = vld [vmem:[#allocation2 + $0x40] sm:$0xff]  ;;  %v78_v22 = vld [vmem:[#allocation2 + $0x48] sm:$0xff] }
  0x16   :  { %1032 = vmatmul.msk.f32.vlgmr.msra.gmra.mxu3 %vm121_vm1, %v1188_v5  ;;  %257 = vmatpush.msrb.mxu0 %v73_v11  ;;  %v79_v23 = vld [vmem:[#allocation2 + $0x50] sm:$0xff]  ;;  %v80_v24 = vld [vmem:[#allocation2 + $0x58] sm:$0xff]  ;;  %v1224_v29 = vld [vmem:[#allocation4 + $0xe0] sm:$0xff] }
  0x17   :  { %277 = vmatpush.msrb.mxu1 %v74_v12  ;;  %1037 = vmatpush.msk.msrb.mxu2 %vm125_vm0, %v87_v13  ;;  %v1214_v25 = vld [vmem:[#allocation4 + $0xf0] sm:$0xff]  ;;  %v1218_v27 = vld [vmem:[#allocation4 + $0xf8] sm:$0xff]  ;;  %v1227_v30 = vld [vmem:[#allocation4 + $0x1e0] sm:$0xff] }
  0x18   :  { %1039 = vmatpush.msk.msrb.mxu3 %vm125_vm0, %v88_v14  ;;  %1041 = vmatpush.msk.msra.mxu0 %vm125_vm0, %v89_v15  ;;  %v1216_v26 = vld [vmem:[#allocation4 + $0x1f0] sm:$0xff]  ;;  %v1222_v28 = vld [vmem:[#allocation4 + $0x1f8] sm:$0xff]  ;;  %v1229_v31 = vld [vmem:[#allocation4 + $0xe8] sm:$0xff] }
  0x19   :  { %297 = vmatpush.msrb.mxu2 %v75_v16  ;;  %1043 = vmatpush.msk.msra.mxu1 %vm125_vm0, %v90_v17  ;;  %v1233_v32 = vld [vmem:[#allocation4 + $0x1e8] sm:$0xff]  ;;  %v1235_v33 = vld [vmem:[#allocation4 + $0xd0] sm:$0xff]  ;;  %v1241_v35 = vld [vmem:[#allocation4 + $0xd8] sm:$0xff] }
  0x1a   :  { %1034 = vmatmul.msk.f32.vlgmr.msrb.gmra.mxu0 %vm121_vm1, %v1188_v5  ;;  %317 = vmatpush.msrb.mxu3 %v76_v18  ;;  %v1239_v34 = vld [vmem:[#allocation4 + $0x1d0] sm:$0xff]  ;;  %v1245_v36 = vld [vmem:[#allocation4 + $0x1d8] sm:$0xff]  ;;  %v1247_v37 = vld [vmem:[#allocation4 + $0xc0] sm:$0xff] }
  0x1b   :  { %1036 = vmatmul.msk.f32.vlgmr.msrb.gmra.mxu1 %vm121_vm1, %v1188_v5  ;;  %1045 = vmatpush.msk.msra.mxu2 %vm125_vm0, %v91_v19  ;;  %v1251_v38 = vld [vmem:[#allocation4 + $0x1c0] sm:$0xff]  ;;  %v1253_v39 = vld [vmem:[#allocation4 + $0xc8] sm:$0xff]  ;;  %v1259_v41 = vld [vmem:[#allocation4 + $0xb0] sm:$0xff] }
  0x1c   :  { %1038 = vmatmul.msk.f32.vlgmr.msrb.gmra.mxu2 %vm121_vm1, %v1188_v5  ;;  %1047 = vmatpush.msk.msra.mxu3 %vm125_vm0, %v92_v20  ;;  %v1257_v40 = vld [vmem:[#allocation4 + $0x1c8] sm:$0xff]  ;;  %v1263_v42 = vld [vmem:[#allocation4 + $0x1b0] sm:$0xff]  ;;  %v1265_v43 = vld [vmem:[#allocation4 + $0xb8] sm:$0xff] }
  0x1d   :  { %337 = vmatpush.msra.mxu0 %v77_v21  ;;  %357 = vmatpush.msra.mxu1 %v78_v22  ;;  %v1269_v44 = vld [vmem:[#allocation4 + $0x1b8] sm:$0xff]  ;;  %v1271_v45 = vld [vmem:[#allocation4 + $0xa0] sm:$0xff]  ;;  %v1277_v47 = vld [vmem:[#allocation4 + $0xa8] sm:$0xff] }
  0x1e   :  { %1040 = vmatmul.msk.f32.vlgmr.msrb.gmra.mxu3 %vm121_vm1, %v1188_v5  ;;  %377 = vmatpush.msra.mxu2 %v79_v23  ;;  %v1275_v46 = vld [vmem:[#allocation4 + $0x1a0] sm:$0xff]  ;;  %v1281_v48 = vld [vmem:[#allocation4 + $0x1a8] sm:$0xff]  ;;  %v1283_v49 = vld [vmem:[#allocation4 + $0x90] sm:$0xff] }
  0x1f   :  { %397 = vmatpush.msra.mxu3 %v80_v24  ;;  %484 = vmatpush.msrb.mxu0 %v1214_v25  ;;  %v1287_v50 = vld [vmem:[#allocation4 + $0x190] sm:$0xff]  ;;  %v1289_v51 = vld [vmem:[#allocation4 + $0x98] sm:$0xff]  ;;  %v1295_v53 = vld [vmem:[#allocation4 + $0x80] sm:$0xff] }
  0x20   :  { %504 = vmatpush.msrb.mxu1 %v1216_v26  ;;  %524 = vmatpush.msrb.mxu2 %v1218_v27  ;;  %v1293_v52 = vld [vmem:[#allocation4 + $0x198] sm:$0xff]  ;;  %v1299_v54 = vld [vmem:[#allocation4 + $0x180] sm:$0xff]  ;;  %v1301_v55 = vld [vmem:[#allocation4 + $0x88] sm:$0xff] }
  0x21   :  { %544 = vmatpush.msrb.mxu3 %v1222_v28  ;;  %485 = vmatpush.msrb.mxu0 %v1224_v29  ;;  %v1305_v56 = vld [vmem:[#allocation4 + $0x188] sm:$0xff]  ;;  %v1307_v57 = vld [vmem:[#allocation4 + $0x70] sm:$0xff]  ;;  %v1313_v59 = vld [vmem:[#allocation4 + $0x78] sm:$0xff] }
  0x22   :  { %505 = vmatpush.msrb.mxu1 %v1227_v30  ;;  %525 = vmatpush.msrb.mxu2 %v1229_v31  ;;  %v1311_v58 = vld [vmem:[#allocation4 + $0x170] sm:$0xff]  ;;  %v1317_v60 = vld [vmem:[#allocation4 + $0x178] sm:$0xff]  ;;  %v1319_v61 = vld [vmem:[#allocation4 + $0x60] sm:$0xff] }
  0x23   :  { %545 = vmatpush.msrb.mxu3 %v1233_v32  ;;  %486 = vmatpush.msrb.mxu0 %v1235_v33  ;;  %1850 = vst [vmem:[#allocation9_spill] sm:$0xff] %v1317_v60  ;;  %v1323_v62 = vld [vmem:[#allocation4 + $0x160] sm:$0xff]  ;;  %v1325_v63 = vld [vmem:[#allocation4 + $0x68] sm:$0xff]  ;;  %v1331_v1 = vld [vmem:[#allocation4 + $0x50] sm:$0xff] }
  0x24   :  { %506 = vmatpush.msrb.mxu1 %v1239_v34  ;;  %526 = vmatpush.msrb.mxu2 %v1241_v35  ;;  %1851 = vst [vmem:[#allocation10_spill] sm:$0xff] %v1319_v61  ;;  %v1329_v0 = vld [vmem:[#allocation4 + $0x168] sm:$0xff]  ;;  %v1335_v2 = vld [vmem:[#allocation4 + $0x150] sm:$0xff]  ;;  %v1337_v3 = vld [vmem:[#allocation4 + $0x58] sm:$0xff] }
  0x25   :  { %546 = vmatpush.msrb.mxu3 %v1245_v36  ;;  %487 = vmatpush.msrb.mxu0 %v1247_v37  ;;  %1852 = vst [vmem:[#allocation11_spill] sm:$0xff] %v1325_v63  ;;  %v1341_v4 = vld [vmem:[#allocation4 + $0x158] sm:$0xff]  ;;  %v1343_v6 = vld [vmem:[#allocation4 + $0x40] sm:$0xff]  ;;  %v1349_v8 = vld [vmem:[#allocation4 + $0x48] sm:$0xff] }
  0x26   :  { %507 = vmatpush.msrb.mxu1 %v1251_v38  ;;  %527 = vmatpush.msrb.mxu2 %v1253_v39  ;;  %1853 = vst [vmem:[#allocation12_spill] sm:$0xff] %v1329_v0  ;;  %v1347_v7 = vld [vmem:[#allocation4 + $0x140] sm:$0xff]  ;;  %v1353_v9 = vld [vmem:[#allocation4 + $0x148] sm:$0xff]  ;;  %v1355_v10 = vld [vmem:[#allocation4 + $0x30] sm:$0xff] }
  0x27   :  { %547 = vmatpush.msrb.mxu3 %v1257_v40  ;;  %488 = vmatpush.msrb.mxu0 %v1259_v41  ;;  %1854 = vst [vmem:[#allocation13_spill] sm:$0xff] %v1331_v1  ;;  %v1359_v11 = vld [vmem:[#allocation4 + $0x130] sm:$0xff]  ;;  %v1361_v12 = vld [vmem:[#allocation4 + $0x38] sm:$0xff]  ;;  %v1369_v14 = vld [vmem:[#allocation4 + $0x20] sm:$0xff] }
  0x28   :  { %508 = vmatpush.msrb.mxu1 %v1263_v42  ;;  %528 = vmatpush.msrb.mxu2 %v1265_v43  ;;  %1855 = vst [vmem:[#allocation14_spill] sm:$0xff] %v1335_v2  ;;  %v1365_v13 = vld [vmem:[#allocation4 + $0x138] sm:$0xff]  ;;  %v1371_v15 = vld [vmem:[#allocation4 + $0x120] sm:$0xff]  ;;  %v1375_v16 = vld [vmem:[#allocation4 + $0x28] sm:$0xff] }
  0x29   :  { %548 = vmatpush.msrb.mxu3 %v1269_v44  ;;  %489 = vmatpush.msrb.mxu0 %v1271_v45  ;;  %1856 = vst [vmem:[#allocation15_spill] sm:$0xff] %v1337_v3  ;;  %v1377_v17 = vld [vmem:[#allocation4 + $0x128] sm:$0xff]  ;;  %v1382_v18 = vld [vmem:[#allocation4 + $0x10] sm:$0xff]  ;;  %v1388_v20 = vld [vmem:[#allocation4 + $0x18] sm:$0xff] }
  0x2a   :  { %509 = vmatpush.msrb.mxu1 %v1275_v46  ;;  %529 = vmatpush.msrb.mxu2 %v1277_v47  ;;  %1857 = vst [vmem:[#allocation16_spill] sm:$0xff] %v1341_v4  ;;  %v1386_v19 = vld [vmem:[#allocation4 + $0x110] sm:$0xff]  ;;  %v1392_v21 = vld [vmem:[#allocation4 + $0x118] sm:$0xff]  ;;  %v1394_v22 = vld [vmem:[#allocation4] sm:$0xff] }
  0x2b   :  { %549 = vmatpush.msrb.mxu3 %v1281_v48  ;;  %490 = vmatpush.msrb.mxu0 %v1283_v49  ;;  %1858 = vst [vmem:[#allocation17_spill] sm:$0xff] %v1343_v6  ;;  %v1399_v23 = vld [vmem:[#allocation4 + $0x100] sm:$0xff]  ;;  %v1401_v24 = vld [vmem:[#allocation4 + $0x8] sm:$0xff] }
  0x2c   :  { %510 = vmatpush.msrb.mxu1 %v1287_v50  ;;  %530 = vmatpush.msrb.mxu2 %v1289_v51  ;;  %1859 = vst [vmem:[#allocation18_spill] sm:$0xff] %v1347_v7 }
  0x2d   :  { %550 = vmatpush.msrb.mxu3 %v1293_v52  ;;  %491 = vmatpush.msrb.mxu0 %v1295_v53  ;;  %1860 = vst [vmem:[#allocation19_spill] sm:$0xff] %v1349_v8 }
  0x2e   :  { %511 = vmatpush.msrb.mxu1 %v1299_v54  ;;  %531 = vmatpush.msrb.mxu2 %v1301_v55  ;;  %1861 = vst [vmem:[#allocation20_spill] sm:$0xff] %v1353_v9 }
  0x2f   :  { %551 = vmatpush.msrb.mxu3 %v1305_v56  ;;  %492 = vmatpush.msrb.mxu0 %v1307_v57  ;;  %1862 = vst [vmem:[#allocation21_spill] sm:$0xff] %v1355_v10 }
  0x30   :  { %512 = vmatpush.msrb.mxu1 %v1311_v58  ;;  %532 = vmatpush.msrb.mxu2 %v1313_v59  ;;  %1863 = vst [vmem:[#allocation22_spill] sm:$0xff] %v1361_v12 }
  0x31   :  { %552 = vmatpush.msrb.mxu3 %v1317_v60  ;;  %493 = vmatpush.msrb.mxu0 %v1319_v61  ;;  %1864 = vst [vmem:[#allocation23_spill] sm:$0xff] %v1369_v14 }
  0x32   :  { %513 = vmatpush.msrb.mxu1 %v1323_v62  ;;  %533 = vmatpush.msrb.mxu2 %v1325_v63  ;;  %1865 = vst [vmem:[#allocation24_spill] sm:$0xff] %v1371_v15 }
  0x33   :  { %553 = vmatpush.msrb.mxu3 %v1329_v0  ;;  %494 = vmatpush.msrb.mxu0 %v1331_v1  ;;  %1866 = vst [vmem:[#allocation25_spill] sm:$0xff] %v1375_v16 }
  0x34   :  { %514 = vmatpush.msrb.mxu1 %v1335_v2  ;;  %534 = vmatpush.msrb.mxu2 %v1337_v3  ;;  %1867 = vst [vmem:[#allocation26_spill] sm:$0xff] %v1377_v17 }
  0x35   :  { %554 = vmatpush.msrb.mxu3 %v1341_v4  ;;  %495 = vmatpush.msrb.mxu0 %v1343_v6  ;;  %1868 = vst [vmem:[#allocation27_spill] sm:$0xff] %v1382_v18 }
  0x36   :  { %515 = vmatpush.msrb.mxu1 %v1347_v7  ;;  %535 = vmatpush.msrb.mxu2 %v1349_v8  ;;  %1869 = vst [vmem:[#allocation28_spill] sm:$0xff] %v1386_v19 }
  0x37   :  { %555 = vmatpush.msrb.mxu3 %v1353_v9  ;;  %496 = vmatpush.msrb.mxu0 %v1355_v10  ;;  %1870 = vst [vmem:[#allocation29_spill] sm:$0xff] %v1388_v20 }
  0x38   :  { %516 = vmatpush.msrb.mxu1 %v1359_v11  ;;  %536 = vmatpush.msrb.mxu2 %v1361_v12  ;;  %1871 = vst [vmem:[#allocation30_spill] sm:$0xff] %v1392_v21 }
  0x39   :  { %556 = vmatpush.msrb.mxu3 %v1365_v13  ;;  %1042 = vmatmul.msk.f32.vlgmr.msra.gmra.mxu0 %vm121_vm1, %v1188_v5  ;;  %1872 = vst [vmem:[#allocation31_spill] sm:$0xff] %v1394_v22 }
  0x3a   :  { %497 = vmatpush.msrb.mxu0 %v1369_v14  ;;  %517 = vmatpush.msrb.mxu1 %v1371_v15  ;;  %1873 = vst [vmem:[#allocation32_spill] sm:$0xff] %v1401_v24 }
  0x3b   :  { %537 = vmatpush.msrb.mxu2 %v1375_v16  ;;  %557 = vmatpush.msrb.mxu3 %v1377_v17  ;;  %v1405_v16 = vld [vmem:[#allocation4 + $0x108] sm:$0xff] }
  0x3c   :  { %1044 = vmatmul.msk.f32.vlgmr.msra.gmra.mxu1 %vm121_vm1, %v1188_v5  ;;  %498 = vmatpush.msrb.mxu0 %v1382_v18  ;;  %1874 = vst [vmem:[#allocation33_spill] sm:$0xff] %v1405_v16 }
  0x3d   :  { %518 = vmatpush.msrb.mxu1 %v1386_v19  ;;  %538 = vmatpush.msrb.mxu2 %v1388_v20 }
  0x3e   :  { %558 = vmatpush.msrb.mxu3 %v1392_v21  ;;  %499 = vmatpush.msrb.mxu0 %v1394_v22 }
  0x3f   :  { %519 = vmatpush.msrb.mxu1 %v1399_v23  ;;  %539 = vmatpush.msrb.mxu2 %v1401_v24 }
  0x40   :  { %559 = vmatpush.msrb.mxu3 %v1405_v16  ;;  %1046 = vmatmul.msk.f32.vlgmr.msra.gmra.mxu2 %vm121_vm1, %v1188_v5 }
  0x41   :  { %1048 = vmatmul.msk.f32.vlgmr.msra.gmra.mxu3 %vm121_vm1, %v1188_v5  ;;  %577 = vmatpush.msra.mxu0 %v1214_v25  ;;  %v1875_v5 = vld [vmem:[#allocation25_spill] sm:$0xff] }
  0x42   :  { %597 = vmatpush.msra.mxu1 %v1216_v26  ;;  %617 = vmatpush.msra.mxu2 %v1218_v27 }
  0x43   :  { %637 = vmatpush.msra.mxu3 %v1222_v28  ;;  %578 = vmatpush.msra.mxu0 %v1224_v29 }
  0x44   :  { %598 = vmatpush.msra.mxu1 %v1227_v30  ;;  %618 = vmatpush.msra.mxu2 %v1229_v31 }
  0x45   :  { %638 = vmatpush.msra.mxu3 %v1233_v32  ;;  %579 = vmatpush.msra.mxu0 %v1235_v33 }
  0x46   :  { %599 = vmatpush.msra.mxu1 %v1239_v34  ;;  %619 = vmatpush.msra.mxu2 %v1241_v35 }
  0x47   :  { %639 = vmatpush.msra.mxu3 %v1245_v36  ;;  %580 = vmatpush.msra.mxu0 %v1247_v37 }
  0x48   :  { %600 = vmatpush.msra.mxu1 %v1251_v38  ;;  %620 = vmatpush.msra.mxu2 %v1253_v39 }
  0x49   :  { %640 = vmatpush.msra.mxu3 %v1257_v40  ;;  %581 = vmatpush.msra.mxu0 %v1259_v41 }
  0x4a   :  { %601 = vmatpush.msra.mxu1 %v1263_v42  ;;  %621 = vmatpush.msra.mxu2 %v1265_v43 }
  0x4b   :  { %641 = vmatpush.msra.mxu3 %v1269_v44  ;;  %582 = vmatpush.msra.mxu0 %v1271_v45 }
  0x4c   :  { %602 = vmatpush.msra.mxu1 %v1275_v46  ;;  %622 = vmatpush.msra.mxu2 %v1277_v47 }
  0x4d   :  { %642 = vmatpush.msra.mxu3 %v1281_v48  ;;  %583 = vmatpush.msra.mxu0 %v1283_v49 }
  0x4e   :  { %603 = vmatpush.msra.mxu1 %v1287_v50  ;;  %623 = vmatpush.msra.mxu2 %v1289_v51 }
  0x4f   :  { %643 = vmatpush.msra.mxu3 %v1293_v52  ;;  %584 = vmatpush.msra.mxu0 %v1295_v53 }
  0x50   :  { %604 = vmatpush.msra.mxu1 %v1299_v54  ;;  %624 = vmatpush.msra.mxu2 %v1301_v55 }
  0x51   :  { %644 = vmatpush.msra.mxu3 %v1305_v56  ;;  %585 = vmatpush.msra.mxu0 %v1307_v57 }
  0x52   :  { %605 = vmatpush.msra.mxu1 %v1311_v58  ;;  %625 = vmatpush.msra.mxu2 %v1313_v59 }
  0x53   :  { %645 = vmatpush.msra.mxu3 %v1317_v60  ;;  %586 = vmatpush.msra.mxu0 %v1319_v61 }
  0x54   :  { %606 = vmatpush.msra.mxu1 %v1323_v62  ;;  %626 = vmatpush.msra.mxu2 %v1325_v63 }
  0x55   :  { %646 = vmatpush.msra.mxu3 %v1329_v0  ;;  %587 = vmatpush.msra.mxu0 %v1331_v1 }
  0x56   :  { %607 = vmatpush.msra.mxu1 %v1335_v2  ;;  %627 = vmatpush.msra.mxu2 %v1337_v3 }
  0x57   :  { %647 = vmatpush.msra.mxu3 %v1341_v4  ;;  %588 = vmatpush.msra.mxu0 %v1343_v6 }
  0x58   :  { %608 = vmatpush.msra.mxu1 %v1347_v7  ;;  %628 = vmatpush.msra.mxu2 %v1349_v8 }
  0x59   :  { %648 = vmatpush.msra.mxu3 %v1353_v9  ;;  %589 = vmatpush.msra.mxu0 %v1355_v10 }
  0x5a   :  { %609 = vmatpush.msra.mxu1 %v1359_v11  ;;  %629 = vmatpush.msra.mxu2 %v1361_v12 }
  0x5b   :  { %649 = vmatpush.msra.mxu3 %v1365_v13  ;;  %590 = vmatpush.msra.mxu0 %v1369_v14 }
  0x5c   :  { %610 = vmatpush.msra.mxu1 %v1371_v15  ;;  %630 = vmatpush.msra.mxu2 %v1875_v5 }
  0x5d   :  { %650 = vmatpush.msra.mxu3 %v1377_v17  ;;  %591 = vmatpush.msra.mxu0 %v1382_v18  ;;  %v1483_v17 = vld [vmem:[%s1798_s2] sm:$0xff] }
  0x5e   :  { %611 = vmatpush.msra.mxu1 %v1386_v19  ;;  %631 = vmatpush.msra.mxu2 %v1388_v20  ;;  %v97_v18 = vperm.slane %v1483_v17, 0  ;;  %v98_v19 = vperm.slane %v1483_v17, 1 }
  0x5f   :  { %651 = vmatpush.msra.mxu3 %v1392_v21  ;;  %592 = vmatpush.msra.mxu0 %v1394_v22 }
  0x60   :  { %612 = vmatpush.msra.mxu1 %v1399_v23  ;;  %632 = vmatpush.msra.mxu2 %v1401_v24  ;;  %v99_v24 = vperm.slane %v1483_v17, 2 }
  0x61   :  { %652 = vmatpush.msra.mxu3 %v1405_v16  ;;  %v100_v16 = vperm.slane %v1483_v17, 3 }
  0x8f   :  { %v179_v20 = vpop.f32.mrf.mxu0 }
  0x90   :  { %v199_v5 = vpop.f32.mrf.mxu1  ;;  %v180_v21 = vadd.f32 %v179_v20, %v97_v18 }
  0x91   :  { %v200_v15 = vadd.f32 %v199_v5, %v98_v19 }
  0x92   :  { %v402_v22 = vmax.f32 %v180_v21, 0.0 }
  0x93   :  { %v403_v14 = vmax.f32 %v200_v15, 0.0 }
  0x94   :  { %500 = vmatmul.f32.vlgmr.msrb.gmra.mxu0 %v402_v22  ;;  %540 = vmatmul.f32.vlgmr.msrb.gmra.mxu2 %v402_v22 }
  0x95   :  { %520 = vmatmul.f32.vlgmr.msrb.gmra.mxu1 %v403_v14  ;;  %560 = vmatmul.f32.vlgmr.msrb.gmra.mxu3 %v403_v14 }
  0x96   :  { %665 = vmatpush.msrb.mxu0 %v1214_v25  ;;  %685 = vmatpush.msrb.mxu1 %v1216_v26 }
  0x97   :  { %705 = vmatpush.msrb.mxu2 %v1218_v27  ;;  %725 = vmatpush.msrb.mxu3 %v1222_v28  ;;  %v219_v18 = vpop.f32.mrf.mxu2  ;;  %v259_v22 = vpop.f32.mrf.mxu0 }
  0x98   :  { %666 = vmatpush.msrb.mxu0 %v1224_v29  ;;  %686 = vmatpush.msrb.mxu1 %v1227_v30  ;;  %v220_v15 = vadd.f32 %v219_v18, %v99_v24  ;;  %v102_v24 = vperm.slane %v1483_v17, 5  ;;  %v279_v18 = vpop.f32.mrf.mxu1 }
  0x99   :  { %706 = vmatpush.msrb.mxu2 %v1229_v31  ;;  %726 = vmatpush.msrb.mxu3 %v1233_v32  ;;  %v239_v14 = vpop.f32.mrf.mxu3 }
  0x9a   :  { %v404_v19 = vmax.f32 %v220_v15, 0.0  ;;  %667 = vmatpush.msrb.mxu0 %v1235_v33  ;;  %687 = vmatpush.msrb.mxu1 %v1239_v34  ;;  %v240_v20 = vadd.f32 %v239_v14, %v100_v16  ;;  %v101_v16 = vperm.slane %v1483_v17, 4  ;;  %v1876_v15 = vld [vmem:[#allocation23_spill] sm:$0xff]  ;;  %v1877_v14 = vld [vmem:[#allocation24_spill] sm:$0xff] }
  0x9b   :  { %707 = vmatpush.msrb.mxu2 %v1241_v35  ;;  %727 = vmatpush.msrb.mxu3 %v1245_v36 }
  0x9c   :  { %668 = vmatpush.msrb.mxu0 %v1247_v37  ;;  %688 = vmatpush.msrb.mxu1 %v1251_v38  ;;  %v405_v21 = vmax.f32 %v240_v20, 0.0  ;;  %v260_v5 = vadd.f32 %v259_v22, %v101_v16  ;;  %v1879_v20 = vld [vmem:[#allocation26_spill] sm:$0xff]  ;;  %v1882_v16 = vld [vmem:[#allocation29_spill] sm:$0xff] }
  0x9d   :  { %708 = vmatpush.msrb.mxu2 %v1253_v39  ;;  %728 = vmatpush.msrb.mxu3 %v1257_v40  ;;  %v1883_v22 = vld [vmem:[#allocation30_spill] sm:$0xff] }
  0x9e   :  { %633 = vmatmul.f32.vlgmr.msra.gmra.mxu2 %v404_v19  ;;  %669 = vmatpush.msrb.mxu0 %v1259_v41 }
  0x9f   :  { %689 = vmatpush.msrb.mxu1 %v1263_v42  ;;  %709 = vmatpush.msrb.mxu2 %v1265_v43 }
  0xa0   :  { %729 = vmatpush.msrb.mxu3 %v1269_v44  ;;  %670 = vmatpush.msrb.mxu0 %v1271_v45 }
  0xa1   :  { %653 = vmatmul.f32.vlgmr.msra.gmra.mxu3 %v405_v21  ;;  %690 = vmatpush.msrb.mxu1 %v1275_v46 }
  0xa2   :  { %710 = vmatpush.msrb.mxu2 %v1277_v47  ;;  %730 = vmatpush.msrb.mxu3 %v1281_v48 }
  0xa3   :  { %671 = vmatpush.msrb.mxu0 %v1283_v49  ;;  %691 = vmatpush.msrb.mxu1 %v1287_v50 }
  0xa4   :  { %711 = vmatpush.msrb.mxu2 %v1289_v51  ;;  %731 = vmatpush.msrb.mxu3 %v1293_v52 }
  0xa5   :  { %593 = vmatmul.f32.vlgmr.msra.gmra.mxu0 %v404_v19  ;;  %692 = vmatpush.msrb.mxu1 %v1299_v54  ;;  %v1878_v19 = vld [vmem:[#allocation25_spill] sm:$0xff] }
  0xa6   :  { %672 = vmatpush.msrb.mxu0 %v1295_v53  ;;  %712 = vmatpush.msrb.mxu2 %v1301_v55 }
  0xa7   :  { %732 = vmatpush.msrb.mxu3 %v1305_v56  ;;  %613 = vmatmul.f32.vlgmr.msra.gmra.mxu1 %v405_v21  ;;  %v280_v21 = vadd.f32 %v279_v18, %v102_v24  ;;  %v299_v24 = vpop.f32.mrf.mxu2  ;;  %v1888_v18 = vld [vmem:[#allocation20_spill] sm:$0xff] }
  0xa8   :  { %673 = vmatpush.msrb.mxu0 %v1307_v57  ;;  %693 = vmatpush.msrb.mxu1 %v1311_v58 }
  0xa9   :  { %713 = vmatpush.msrb.mxu2 %v1313_v59  ;;  %733 = vmatpush.msrb.mxu3 %v1317_v60 }
  0xaa   :  { %674 = vmatpush.msrb.mxu0 %v1319_v61  ;;  %694 = vmatpush.msrb.mxu1 %v1323_v62 }
  0xab   :  { %714 = vmatpush.msrb.mxu2 %v1325_v63  ;;  %734 = vmatpush.msrb.mxu3 %v1329_v0 }
  0xac   :  { %675 = vmatpush.msrb.mxu0 %v1331_v1  ;;  %695 = vmatpush.msrb.mxu1 %v1335_v2 }
  0xad   :  { %715 = vmatpush.msrb.mxu2 %v1337_v3  ;;  %735 = vmatpush.msrb.mxu3 %v1341_v4 }
  0xae   :  { %676 = vmatpush.msrb.mxu0 %v1343_v6  ;;  %696 = vmatpush.msrb.mxu1 %v1347_v7 }
  0xaf   :  { %716 = vmatpush.msrb.mxu2 %v1349_v8  ;;  %736 = vmatpush.msrb.mxu3 %v1353_v9  ;;  %v406_v9 = vmax.f32 %v260_v5, 0.0  ;;  %v1880_v8 = vld [vmem:[#allocation27_spill] sm:$0xff] }
  0xb0   :  { %677 = vmatpush.msrb.mxu0 %v1355_v10  ;;  %697 = vmatpush.msrb.mxu1 %v1359_v11  ;;  %v1881_v10 = vld [vmem:[#allocation28_spill] sm:$0xff]  ;;  %v1887_v5 = vld [vmem:[#allocation19_spill] sm:$0xff] }
  0xb1   :  { %717 = vmatpush.msrb.mxu2 %v1361_v12  ;;  %737 = vmatpush.msrb.mxu3 %v1365_v13  ;;  %v1884_v12 = vld [vmem:[#allocation31_spill] sm:$0xff] }
  0xb2   :  { %678 = vmatpush.msrb.mxu0 %v1876_v15  ;;  %698 = vmatpush.msrb.mxu1 %v1877_v14  ;;  %v407_v15 = vmax.f32 %v280_v21, 0.0  ;;  %v1885_v14 = vld [vmem:[#allocation32_spill] sm:$0xff]  ;;  %v1889_v21 = vld [vmem:[#allocation21_spill] sm:$0xff] }
  0xb3   :  { %718 = vmatpush.msrb.mxu2 %v1878_v19  ;;  %738 = vmatpush.msrb.mxu3 %v1879_v20  ;;  %v1886_v19 = vld [vmem:[#allocation33_spill] sm:$0xff] }
  0xb4   :  { %679 = vmatpush.msrb.mxu0 %v1880_v8  ;;  %699 = vmatpush.msrb.mxu1 %v1881_v10 }
  0xb5   :  { %719 = vmatpush.msrb.mxu2 %v1882_v16  ;;  %739 = vmatpush.msrb.mxu3 %v1883_v22 }
  0xb6   :  { %680 = vmatpush.msrb.mxu0 %v1884_v12  ;;  %700 = vmatpush.msrb.mxu1 %v1399_v23 }
  0xb7   :  { %720 = vmatpush.msrb.mxu2 %v1885_v14  ;;  %740 = vmatpush.msrb.mxu3 %v1886_v19 }
  0xb8   :  { %721 = vmatmul.f32.vlgmr.msrb.gmra.mxu2 %v406_v9  ;;  %753 = vmatpush.msra.mxu0 %v1214_v25 }
  0xb9   :  { %773 = vmatpush.msra.mxu1 %v1216_v26  ;;  %793 = vmatpush.msra.mxu2 %v1218_v27 }
  0xba   :  { %813 = vmatpush.msra.mxu3 %v1222_v28  ;;  %754 = vmatpush.msra.mxu0 %v1224_v29 }
  0xbb   :  { %741 = vmatmul.f32.vlgmr.msrb.gmra.mxu3 %v407_v15  ;;  %774 = vmatpush.msra.mxu1 %v1227_v30 }
  0xbc   :  { %794 = vmatpush.msra.mxu2 %v1229_v31  ;;  %814 = vmatpush.msra.mxu3 %v1233_v32 }
  0xbd   :  { %755 = vmatpush.msra.mxu0 %v1235_v33  ;;  %775 = vmatpush.msra.mxu1 %v1239_v34 }
  0xbe   :  { %795 = vmatpush.msra.mxu2 %v1241_v35  ;;  %815 = vmatpush.msra.mxu3 %v1245_v36 }
  0xbf   :  { %681 = vmatmul.f32.vlgmr.msrb.gmra.mxu0 %v406_v9  ;;  %776 = vmatpush.msra.mxu1 %v1251_v38  ;;  %v103_v9 = vperm.slane %v1483_v17, 6 }
  0xc0   :  { %756 = vmatpush.msra.mxu0 %v1247_v37  ;;  %796 = vmatpush.msra.mxu2 %v1253_v39 }
  0xc1   :  { %816 = vmatpush.msra.mxu3 %v1257_v40  ;;  %701 = vmatmul.f32.vlgmr.msrb.gmra.mxu1 %v407_v15  ;;  %v104_v15 = vperm.slane %v1483_v17, 7 }
  0xc2   :  { %757 = vmatpush.msra.mxu0 %v1259_v41  ;;  %777 = vmatpush.msra.mxu1 %v1263_v42 }
  0xc3   :  { %797 = vmatpush.msra.mxu2 %v1265_v43  ;;  %817 = vmatpush.msra.mxu3 %v1269_v44 }
  0xc4   :  { %758 = vmatpush.msra.mxu0 %v1271_v45  ;;  %778 = vmatpush.msra.mxu1 %v1275_v46 }
  0xc5   :  { %798 = vmatpush.msra.mxu2 %v1277_v47  ;;  %818 = vmatpush.msra.mxu3 %v1281_v48 }
  0xc6   :  { %759 = vmatpush.msra.mxu0 %v1283_v49  ;;  %779 = vmatpush.msra.mxu1 %v1287_v50 }
  0xc7   :  { %799 = vmatpush.msra.mxu2 %v1289_v51  ;;  %819 = vmatpush.msra.mxu3 %v1293_v52 }
  0xc8   :  { %760 = vmatpush.msra.mxu0 %v1295_v53  ;;  %780 = vmatpush.msra.mxu1 %v1299_v54 }
  0xc9   :  { %800 = vmatpush.msra.mxu2 %v1301_v55  ;;  %820 = vmatpush.msra.mxu3 %v1305_v56 }
  0xca   :  { %761 = vmatpush.msra.mxu0 %v1307_v57  ;;  %781 = vmatpush.msra.mxu1 %v1311_v58 }
  0xcb   :  { %801 = vmatpush.msra.mxu2 %v1313_v59  ;;  %821 = vmatpush.msra.mxu3 %v1317_v60 }
  0xcc   :  { %762 = vmatpush.msra.mxu0 %v1319_v61  ;;  %782 = vmatpush.msra.mxu1 %v1323_v62 }
  0xcd   :  { %802 = vmatpush.msra.mxu2 %v1325_v63  ;;  %822 = vmatpush.msra.mxu3 %v1329_v0 }
  0xce   :  { %763 = vmatpush.msra.mxu0 %v1331_v1  ;;  %783 = vmatpush.msra.mxu1 %v1335_v2  ;;  %v300_v2 = vadd.f32 %v299_v24, %v103_v9  ;;  %v319_v1 = vpop.f32.mrf.mxu3  ;;  %v1895_v24 = vld [vmem:[#allocation14_spill] sm:$0xff] }
  0xcf   :  { %803 = vmatpush.msra.mxu2 %v1337_v3  ;;  %823 = vmatpush.msra.mxu3 %v1341_v4  ;;  %v1890_v3 = vld [vmem:[#allocation22_spill] sm:$0xff]  ;;  %v1891_v4 = vld [vmem:[#allocation23_spill] sm:$0xff] }
  0xd0   :  { %764 = vmatpush.msra.mxu0 %v1343_v6  ;;  %784 = vmatpush.msra.mxu1 %v1347_v7  ;;  %v1892_v6 = vld [vmem:[#allocation24_spill] sm:$0xff]  ;;  %v1893_v7 = vld [vmem:[#allocation25_spill] sm:$0xff]  ;;  %v408_v17 = vmax.f32 %v300_v2, 0.0 }
  0xd1   :  { %804 = vmatpush.msra.mxu2 %v1887_v5  ;;  %824 = vmatpush.msra.mxu3 %v1888_v18  ;;  %v320_v18 = vadd.f32 %v319_v1, %v104_v15  ;;  %v1660_v1 = vld [vmem:[%s1798_s2 + $0x8] sm:$0xf]  ;;  %v1896_v15 = vld [vmem:[#allocation15_spill] sm:$0xff] }
  0xd2   :  { %765 = vmatpush.msra.mxu0 %v1889_v21  ;;  %785 = vmatpush.msra.mxu1 %v1359_v11  ;;  %v1894_v2 = vld [vmem:[#allocation13_spill] sm:$0xff] }
  0xd3   :  { %805 = vmatpush.msra.mxu2 %v1890_v3  ;;  %825 = vmatpush.msra.mxu3 %v1365_v13  ;;  %v409_v9 = vmax.f32 %v320_v18, 0.0  ;;  %v105_v18 = vperm.slane %v1660_v1, 0 }
  0xd4   :  { %766 = vmatpush.msra.mxu0 %v1891_v4  ;;  %786 = vmatpush.msra.mxu1 %v1892_v6 }
  0xd5   :  { %806 = vmatpush.msra.mxu2 %v1893_v7  ;;  %826 = vmatpush.msra.mxu3 %v1879_v20 }
  0xd6   :  { %767 = vmatpush.msra.mxu0 %v1880_v8  ;;  %787 = vmatpush.msra.mxu1 %v1881_v10 }
  0xd7   :  { %807 = vmatpush.msra.mxu2 %v1882_v16  ;;  %827 = vmatpush.msra.mxu3 %v1883_v22 }
  0xd8   :  { %768 = vmatpush.msra.mxu0 %v1884_v12  ;;  %788 = vmatpush.msra.mxu1 %v1399_v23 }
  0xd9   :  { %808 = vmatpush.msra.mxu2 %v1885_v14  ;;  %828 = vmatpush.msra.mxu3 %v1886_v19 }
  0xda   :  { %809 = vmatmul.f32.vlgmr.msra.gmra.mxu2 %v408_v17  ;;  %841 = vmatpush.msrb.mxu0 %v1214_v25 }
  0xdb   :  { %861 = vmatpush.msrb.mxu1 %v1216_v26  ;;  %881 = vmatpush.msrb.mxu2 %v1218_v27 }
  0xdc   :  { %901 = vmatpush.msrb.mxu3 %v1222_v28  ;;  %842 = vmatpush.msrb.mxu0 %v1224_v29 }
  0xdd   :  { %829 = vmatmul.f32.vlgmr.msra.gmra.mxu3 %v409_v9  ;;  %862 = vmatpush.msrb.mxu1 %v1227_v30 }
  0xde   :  { %882 = vmatpush.msrb.mxu2 %v1229_v31  ;;  %902 = vmatpush.msrb.mxu3 %v1233_v32 }
  0xdf   :  { %843 = vmatpush.msrb.mxu0 %v1235_v33  ;;  %863 = vmatpush.msrb.mxu1 %v1239_v34 }
  0xe0   :  { %883 = vmatpush.msrb.mxu2 %v1241_v35  ;;  %903 = vmatpush.msrb.mxu3 %v1245_v36 }
  0xe1   :  { %769 = vmatmul.f32.vlgmr.msra.gmra.mxu0 %v408_v17  ;;  %864 = vmatpush.msrb.mxu1 %v1251_v38  ;;  %v1897_v17 = vld [vmem:[#allocation16_spill] sm:$0xff] }
  0xe2   :  { %844 = vmatpush.msrb.mxu0 %v1247_v37  ;;  %884 = vmatpush.msrb.mxu2 %v1253_v39 }
  0xe3   :  { %904 = vmatpush.msrb.mxu3 %v1257_v40  ;;  %789 = vmatmul.f32.vlgmr.msra.gmra.mxu1 %v409_v9  ;;  %v339_v9 = vpop.f32.mrf.mxu0 }
  0xe4   :  { %845 = vmatpush.msrb.mxu0 %v1259_v41  ;;  %865 = vmatpush.msrb.mxu1 %v1263_v42 }
  0xe5   :  { %885 = vmatpush.msrb.mxu2 %v1265_v43  ;;  %905 = vmatpush.msrb.mxu3 %v1269_v44 }
  0xe6   :  { %846 = vmatpush.msrb.mxu0 %v1271_v45  ;;  %866 = vmatpush.msrb.mxu1 %v1275_v46 }
  0xe7   :  { %886 = vmatpush.msrb.mxu2 %v1277_v47  ;;  %906 = vmatpush.msrb.mxu3 %v1281_v48 }
  0xe8   :  { %847 = vmatpush.msrb.mxu0 %v1283_v49  ;;  %867 = vmatpush.msrb.mxu1 %v1287_v50 }
  0xe9   :  { %887 = vmatpush.msrb.mxu2 %v1289_v51  ;;  %907 = vmatpush.msrb.mxu3 %v1293_v52 }
  0xea   :  { %848 = vmatpush.msrb.mxu0 %v1295_v53  ;;  %868 = vmatpush.msrb.mxu1 %v1299_v54 }
  0xeb   :  { %888 = vmatpush.msrb.mxu2 %v1301_v55  ;;  %908 = vmatpush.msrb.mxu3 %v1305_v56 }
  0xec   :  { %849 = vmatpush.msrb.mxu0 %v1307_v57  ;;  %869 = vmatpush.msrb.mxu1 %v1311_v58 }
  0xed   :  { %889 = vmatpush.msrb.mxu2 %v1313_v59  ;;  %909 = vmatpush.msrb.mxu3 %v1317_v60  ;;  %v1898_v60 = vld [vmem:[#allocation17_spill] sm:$0xff] }
  0xee   :  { %850 = vmatpush.msrb.mxu0 %v1319_v61  ;;  %870 = vmatpush.msrb.mxu1 %v1323_v62  ;;  %v1899_v61 = vld [vmem:[#allocation18_spill] sm:$0xff] }
  0xef   :  { %890 = vmatpush.msrb.mxu2 %v1325_v63  ;;  %910 = vmatpush.msrb.mxu3 %v1329_v0  ;;  %v1900_v63 = vld [vmem:[#allocation20_spill] sm:$0xff]  ;;  %v106_v0 = vperm.slane %v1660_v1, 1 }
  0xf0   :  { %851 = vmatpush.msrb.mxu0 %v1894_v2  ;;  %871 = vmatpush.msrb.mxu1 %v1895_v24  ;;  %v340_v24 = vadd.f32 %v339_v9, %v105_v18  ;;  %v359_v2 = vpop.f32.mrf.mxu1 }
  0xf1   :  { %891 = vmatpush.msrb.mxu2 %v1896_v15  ;;  %911 = vmatpush.msrb.mxu3 %v1897_v17 }
  0xf2   :  { %852 = vmatpush.msrb.mxu0 %v1898_v60  ;;  %872 = vmatpush.msrb.mxu1 %v1899_v61 }
  0xf3   :  { %892 = vmatpush.msrb.mxu2 %v1887_v5  ;;  %912 = vmatpush.msrb.mxu3 %v1900_v63  ;;  %v360_v63 = vadd.f32 %v359_v2, %v106_v0  ;;  %v410_v5 = vmax.f32 %v340_v24, 0.0 }
  0xf4   :  { %853 = vmatpush.msrb.mxu0 %v1889_v21  ;;  %873 = vmatpush.msrb.mxu1 %v1359_v11 }
  0xf5   :  { %893 = vmatpush.msrb.mxu2 %v1890_v3  ;;  %913 = vmatpush.msrb.mxu3 %v1365_v13  ;;  %v411_v18 = vmax.f32 %v360_v63, 0.0 }
  0xf6   :  { %854 = vmatpush.msrb.mxu0 %v1891_v4  ;;  %874 = vmatpush.msrb.mxu1 %v1892_v6 }
  0xf7   :  { %894 = vmatpush.msrb.mxu2 %v1893_v7  ;;  %914 = vmatpush.msrb.mxu3 %v1879_v20 }
  0xf8   :  { %855 = vmatpush.msrb.mxu0 %v1880_v8  ;;  %875 = vmatpush.msrb.mxu1 %v1881_v10 }
  0xf9   :  { %895 = vmatpush.msrb.mxu2 %v1882_v16  ;;  %915 = vmatpush.msrb.mxu3 %v1883_v22 }
  0xfa   :  { %856 = vmatpush.msrb.mxu0 %v1884_v12  ;;  %876 = vmatpush.msrb.mxu1 %v1399_v23 }
  0xfb   :  { %896 = vmatpush.msrb.mxu2 %v1885_v14  ;;  %916 = vmatpush.msrb.mxu3 %v1886_v19 }
  0xfc   :  { %897 = vmatmul.f32.vlgmr.msrb.gmra.mxu2 %v410_v5  ;;  %929 = vmatpush.msra.mxu0 %v1214_v25  ;;  %v478_v25 = vld [vmem:[#allocation6] sm:$0x3] }
  0xfd   :  { %949 = vmatpush.msra.mxu1 %v1216_v26  ;;  %969 = vmatpush.msra.mxu2 %v1218_v27  ;;  %v1901_v26 = vld [vmem:[#allocation9_spill] sm:$0xff]  ;;  %v1728_v27 = vperm.slane %v478_v25, 0 }
  0xfe   :  { %989 = vmatpush.msra.mxu3 %v1222_v28  ;;  %930 = vmatpush.msra.mxu0 %v1224_v29  ;;  %v379_v28 = vpop.f32.mrf.mxu2  ;;  %v399_v29 = vpop.f32.mrf.mxu3 }
  0xff   :  { %917 = vmatmul.f32.vlgmr.msrb.gmra.mxu3 %v411_v18  ;;  %950 = vmatpush.msra.mxu1 %v1227_v30  ;;  %v1902_v30 = vld [vmem:[#allocation10_spill] sm:$0xff] }
 0x100   :  { %970 = vmatpush.msra.mxu2 %v1229_v31  ;;  %990 = vmatpush.msra.mxu3 %v1233_v32  ;;  %v1903_v31 = vld [vmem:[#allocation11_spill] sm:$0xff]  ;;  %v1904_v32 = vld [vmem:[#allocation12_spill] sm:$0xff] }
 0x101   :  { %931 = vmatpush.msra.mxu0 %v1235_v33  ;;  %951 = vmatpush.msra.mxu1 %v1239_v34  ;;  %v1905_v34 = vld [vmem:[#allocation13_spill] sm:$0xff] }
 0x102   :  { %971 = vmatpush.msra.mxu2 %v1241_v35  ;;  %991 = vmatpush.msra.mxu3 %v1245_v36  ;;  %v1906_v35 = vld [vmem:[#allocation14_spill] sm:$0xff] }
 0x103   :  { %857 = vmatmul.f32.vlgmr.msrb.gmra.mxu0 %v410_v5  ;;  %952 = vmatpush.msra.mxu1 %v1251_v38  ;;  %v108_v38 = vperm.slane %v1660_v1, 3 }
 0x104   :  { %932 = vmatpush.msra.mxu0 %v1247_v37  ;;  %972 = vmatpush.msra.mxu2 %v1253_v39  ;;  %v107_v37 = vperm.slane %v1660_v1, 2 }
 0x105   :  { %992 = vmatpush.msra.mxu3 %v1257_v40  ;;  %877 = vmatmul.f32.vlgmr.msrb.gmra.mxu1 %v411_v18  ;;  %v1907_v40 = vld [vmem:[#allocation19_spill] sm:$0xff] }
 0x106   :  { %933 = vmatpush.msra.mxu0 %v1259_v41  ;;  %953 = vmatpush.msra.mxu1 %v1263_v42  ;;  %v1908_v41 = vld [vmem:[#allocation20_spill] sm:$0xff]  ;;  %v1745_v42 = vperm.slane %v478_v25, 1 }
 0x107   :  { %973 = vmatpush.msra.mxu2 %v1265_v43  ;;  %993 = vmatpush.msra.mxu3 %v1269_v44  ;;  %v380_v44 = vadd.f32 %v379_v28, %v107_v37 }
 0x108   :  { %934 = vmatpush.msra.mxu0 %v1271_v45  ;;  %954 = vmatpush.msra.mxu1 %v1275_v46  ;;  %v400_v45 = vadd.f32 %v399_v29, %v108_v38 }
 0x109   :  { %974 = vmatpush.msra.mxu2 %v1277_v47  ;;  %994 = vmatpush.msra.mxu3 %v1281_v48  ;;  %v566_v48 = vld [vmem:[%s1801_s5] sm:$0x3] }
 0x10a   :  { %935 = vmatpush.msra.mxu0 %v1283_v49  ;;  %955 = vmatpush.msra.mxu1 %v1287_v50 }
 0x10b   :  { %975 = vmatpush.msra.mxu2 %v1289_v51  ;;  %995 = vmatpush.msra.mxu3 %v1293_v52  ;;  %v1763_v52 = vperm.slane %v566_v48, 0 }
 0x10c   :  { %936 = vmatpush.msra.mxu0 %v1295_v53  ;;  %956 = vmatpush.msra.mxu1 %v1299_v54  ;;  %v1765_v53 = vperm.slane %v566_v48, 1  ;;  %v412_v54 = vmax.f32 %v380_v44, 0.0 }
 0x10d   :  { %976 = vmatpush.msra.mxu2 %v1301_v55  ;;  %996 = vmatpush.msra.mxu3 %v1305_v56  ;;  %v413_v55 = vmax.f32 %v400_v45, 0.0 }
 0x10e   :  { %937 = vmatpush.msra.mxu0 %v1307_v57  ;;  %957 = vmatpush.msra.mxu1 %v1311_v58 }
 0x10f   :  { %977 = vmatpush.msra.mxu2 %v1313_v59  ;;  %997 = vmatpush.msra.mxu3 %v1901_v26 }
 0x110   :  { %938 = vmatpush.msra.mxu0 %v1902_v30  ;;  %958 = vmatpush.msra.mxu1 %v1323_v62 }
 0x111   :  { %978 = vmatpush.msra.mxu2 %v1903_v31  ;;  %998 = vmatpush.msra.mxu3 %v1904_v32  ;;  %v501_v33 = vpop.f32.mrf.mxu0 }
 0x112   :  { %939 = vmatpush.msra.mxu0 %v1905_v34  ;;  %959 = vmatpush.msra.mxu1 %v1906_v35  ;;  %v502_v36 = vadd.f32 %v501_v33, %v1728_v27  ;;  %v521_v39 = vpop.f32.mrf.mxu1 }
 0x113   :  { %979 = vmatpush.msra.mxu2 %v1896_v15  ;;  %999 = vmatpush.msra.mxu3 %v1897_v17 }
 0x114   :  { %940 = vmatpush.msra.mxu0 %v1898_v60  ;;  %960 = vmatpush.msra.mxu1 %v1899_v61  ;;  %v522_v43 = vadd.f32 %v521_v39, %v502_v36 }
 0x115   :  { %980 = vmatpush.msra.mxu2 %v1907_v40  ;;  %1000 = vmatpush.msra.mxu3 %v1908_v41 }
 0x116   :  { %941 = vmatpush.msra.mxu0 %v1889_v21  ;;  %961 = vmatpush.msra.mxu1 %v1359_v11  ;;  %v564_v50 = vmax.f32 %v522_v43, 0.0 }
 0x117   :  { %981 = vmatpush.msra.mxu2 %v1890_v3  ;;  %1001 = vmatpush.msra.mxu3 %v1365_v13  ;;  %v541_v46 = vpop.f32.mrf.mxu2 }
 0x118   :  { %942 = vmatpush.msra.mxu0 %v1891_v4  ;;  %962 = vmatpush.msra.mxu1 %v1892_v6  ;;  %v561_v47 = vpop.f32.mrf.mxu3  ;;  %v542_v49 = vadd.f32 %v541_v46, %v1745_v42  ;;  %v572_v57 = vmul.f32 %v1763_v52, %v564_v50 }
 0x119   :  { %982 = vmatpush.msra.mxu2 %v1893_v7  ;;  %1002 = vmatpush.msra.mxu3 %v1879_v20 }
 0x11a   :  { %943 = vmatpush.msra.mxu0 %v1880_v8  ;;  %963 = vmatpush.msra.mxu1 %v1881_v10  ;;  %v562_v51 = vadd.f32 %v561_v47, %v542_v49 }
 0x11b   :  { %983 = vmatpush.msra.mxu2 %v1882_v16  ;;  %1003 = vmatpush.msra.mxu3 %v1883_v22 }
 0x11c   :  { %944 = vmatpush.msra.mxu0 %v1884_v12  ;;  %964 = vmatpush.msra.mxu1 %v1399_v23  ;;  %v565_v56 = vmax.f32 %v562_v51, 0.0 }
 0x11d   :  { %984 = vmatpush.msra.mxu2 %v1885_v14  ;;  %1004 = vmatpush.msra.mxu3 %v1886_v19 }
 0x11e   :  { %945 = vmatmul.f32.vlgmr.msra.gmra.mxu0 %v412_v54  ;;  %965 = vmatmul.f32.vlgmr.msra.gmra.mxu1 %v413_v55  ;;  %v573_v58 = vmul.f32 %v1765_v53, %v565_v56 }
 0x11f   :  { %985 = vmatmul.f32.vlgmr.msra.gmra.mxu2 %v412_v54  ;;  %1005 = vmatmul.f32.vlgmr.msra.gmra.mxu3 %v413_v55 }
 0x120   :  { %v574_v60 = vadd.f32 %v573_v58, %v572_v57 }
 0x121   :  { %v634_v59 = vpop.f32.mrf.mxu2 }
 0x122   :  { %v594_v61 = vpop.f32.mrf.mxu0  ;;  %v635_v62 = vadd.f32 %v634_v59, %v1745_v42  ;;  %575 = vadd.xlane.f32.xlu0 %v574_v60 }
 0x123   :  { %v595_v63 = vadd.f32 %v594_v61, %v1728_v27 }
 0x124   :  { %v614_v0 = vpop.f32.mrf.mxu1  ;;  %v654_v3 = vpop.f32.mrf.mxu3 }
 0x125   :  { %v615_v4 = vadd.f32 %v614_v0, %v595_v63  ;;  %v655_v6 = vadd.f32 %v654_v3, %v635_v62 }
 0x127   :  { %v657_v7 = vmax.f32 %v615_v4, 0.0  ;;  %v658_v8 = vmax.f32 %v655_v6, 0.0 }
 0x129   :  { %v659_v10 = vmul.f32 %v657_v7, %v1763_v52  ;;  %v660_v11 = vmul.f32 %v658_v8, %v1765_v53 }
 0x12b   :  { %v661_v12 = vadd.f32 %v660_v11, %v659_v10 }
 0x12d   :  { %662 = vadd.xlane.f32.xlu0 %v661_v12 }
 0x13b   :  { %v722_v13 = vpop.f32.mrf.mxu2 }
 0x13c   :  { %v682_v23 = vpop.f32.mrf.mxu0  ;;  %v723_v14 = vadd.f32 %v722_v13, %v1745_v42 }
 0x13d   :  { %v683_v19 = vadd.f32 %v682_v23, %v1728_v27 }
 0x13e   :  { %v702_v20 = vpop.f32.mrf.mxu1  ;;  %v742_v16 = vpop.f32.mrf.mxu3 }
 0x13f   :  { %v703_v22 = vadd.f32 %v702_v20, %v683_v19  ;;  %v743_v5 = vadd.f32 %v742_v16, %v723_v14 }
 0x141   :  { %v745_v21 = vmax.f32 %v703_v22, 0.0  ;;  %v746_v1 = vmax.f32 %v743_v5, 0.0 }
 0x143   :  { %v747_v2 = vmul.f32 %v745_v21, %v1763_v52  ;;  %v748_v24 = vmul.f32 %v746_v1, %v1765_v53 }
 0x145   :  { %v749_v15 = vadd.f32 %v748_v24, %v747_v2 }
 0x147   :  { %750 = vadd.xlane.f32.xlu1 %v749_v15 }
 0x15d   :  { %v810_v17 = vpop.f32.mrf.mxu2 }
 0x15e   :  { %v770_v9 = vpop.f32.mrf.mxu0  ;;  %v811_v18 = vadd.f32 %v810_v17, %v1745_v42 }
 0x15f   :  { %v771_v25 = vadd.f32 %v770_v9, %v1728_v27 }
 0x160   :  { %v790_v26 = vpop.f32.mrf.mxu1  ;;  %v830_v28 = vpop.f32.mrf.mxu3 }
 0x161   :  { %v791_v29 = vadd.f32 %v790_v26, %v771_v25  ;;  %v831_v30 = vadd.f32 %v830_v28, %v811_v18 }
 0x163   :  { %v833_v31 = vmax.f32 %v791_v29, 0.0  ;;  %v834_v32 = vmax.f32 %v831_v30, 0.0 }
 0x165   :  { %v835_v33 = vmul.f32 %v833_v31, %v1763_v52  ;;  %v836_v34 = vmul.f32 %v834_v32, %v1765_v53 }
 0x167   :  { %v837_v35 = vadd.f32 %v836_v34, %v835_v33 }
 0x169   :  { %838 = vadd.xlane.f32.xlu1 %v837_v35 }
 0x17f   :  { %v898_v36 = vpop.f32.mrf.mxu2 }
 0x180   :  { %v858_v37 = vpop.f32.mrf.mxu0  ;;  %v899_v38 = vadd.f32 %v898_v36, %v1745_v42 }
 0x181   :  { %v859_v39 = vadd.f32 %v858_v37, %v1728_v27 }
 0x182   :  { %v878_v40 = vpop.f32.mrf.mxu1  ;;  %v918_v41 = vpop.f32.mrf.mxu3 }
 0x183   :  { %v879_v43 = vadd.f32 %v878_v40, %v859_v39  ;;  %v919_v44 = vadd.f32 %v918_v41, %v899_v38 }
 0x185   :  { %v921_v45 = vmax.f32 %v879_v43, 0.0  ;;  %v922_v46 = vmax.f32 %v919_v44, 0.0 }
 0x187   :  { %v923_v47 = vmul.f32 %v921_v45, %v1763_v52  ;;  %v924_v48 = vmul.f32 %v922_v46, %v1765_v53 }
 0x189   :  { %v925_v49 = vadd.f32 %v924_v48, %v923_v47 }
 0x18b   :  { %926 = vadd.xlane.f32.xlu2 %v925_v49 }
 0x195   :  { %v576_v3 = vpop.xlane.xlu0 %575 }
 0x19b   :  { %v946_v50 = vpop.f32.mrf.mxu0  ;;  %v966_v54 = vpop.f32.mrf.mxu1 }
 0x19c   :  { %v947_v51 = vadd.f32 %v946_v50, %v1728_v27 }
 0x19e   :  { %v967_v55 = vadd.f32 %v966_v54, %v947_v51 }
 0x1a0   :  { %v1009_v59 = vmax.f32 %v967_v55, 0.0  ;;  %v663_v6 = vpop.xlane.xlu0 %662 }
 0x1a1   :  { %v664_v27 = vadd.f32 %v663_v6, %v576_v3 }
 0x1a2   :  { %v986_v56 = vpop.f32.mrf.mxu2  ;;  %v1006_v58 = vpop.f32.mrf.mxu3  ;;  %v1011_v62 = vmul.f32 %v1009_v59, %v1763_v52 }
 0x1a3   :  { %v987_v57 = vadd.f32 %v986_v56, %v1745_v42 }
 0x1a5   :  { %v1007_v60 = vadd.f32 %v1006_v58, %v987_v57 }
 0x1a7   :  { %v1010_v61 = vmax.f32 %v1007_v60, 0.0 }
 0x1a9   :  { %v1012_v63 = vmul.f32 %v1010_v61, %v1765_v53 }
 0x1ab   :  { %v1013_v0 = vadd.f32 %v1012_v63, %v1011_v62 }
 0x1ad   :  { %1014 = vadd.xlane.f32.xlu2 %v1013_v0 }
 0x1ba   :  { %v751_v4 = vpop.xlane.xlu1 %750 }
 0x1bb   :  { %v752_v10 = vadd.f32 %v751_v4, %v664_v27 }
 0x1dc   :  { %v839_v8 = vpop.xlane.xlu1 %838 }
 0x1dd   :  { %v840_v11 = vadd.f32 %v839_v8, %v752_v10 }
 0x1fe   :  { %v927_v7 = vpop.xlane.xlu2 %926 }
 0x1ff   :  { %v928_v12 = vadd.f32 %v927_v7, %v840_v11 }
 0x220   :  { %v1015_v42 = vpop.xlane.xlu2 %1014 }
 0x221   :  { %v1016_v13 = vadd.f32 %v1015_v42, %v928_v12 }
 0x223   :  { %1018 = vst.msk [vmem:[%s1802_s6] sm:$0xff] %vm1017_vm2, %v1016_v13 }
 0x224   :  { %1023 = vsyncpa [#allocation3], 1 }
 0x225   :  { %1024 = vsyncpa [#allocation5], 1 }

</bundles_post_ra>
